<compile_context>
chip_gen: v7x
topology: tpu7x:2x2x1
jax: 0.10.0
libtpu: 0.0.40
codegen_flags: <defaults>
</compile_context>

<pallas_src>
import math
import functools

import jax
import jax.numpy as jnp
from jax.experimental import pallas as pl
from jax.experimental.pallas import tpu as pltpu


# ----------------------------------------------------------------------------
# Fused encoder-stack kernel: grid = (batch_tile, layer)
# ----------------------------------------------------------------------------
def encoder_stack_kernel(x_ref, bias_ref,
                         wqkv_ref, bqkv_ref, wo_ref, bo_ref,
                         ln1_g_ref, ln1_b_ref,
                         w1_ref, b1_ref, w2_ref, b2_ref,
                         ln2_g_ref, ln2_b_ref,
                         o_ref, x_sc,
                         *, n_heads, eps=1e-5):
    l = pl.program_id(1)
    n_layers = pl.num_programs(1)

    TB, S, H = x_ref.shape
    hd = H // n_heads

    # Layer 0: load the embedded input into the VMEM carry (flattened to 2-D).
    @pl.when(l == 0)
    def _():
        x_sc[...] = x_ref[...].reshape(TB * S, H)

    x = x_sc[...]                                   # (TB*S, H) f32 carried activation
    bias = bias_ref[...]                            # (TB, 1, S) additive mask bias

    # ---- fused QKV projection: one lane-dense MXU call ------------------------
    # Wqkv = [Wq/sqrt(hd) | Wk | Wv]  (scale folded at stacking time).
    qkv = jnp.dot(x.astype(jnp.bfloat16), wqkv_ref[0],
                  preferred_element_type=jnp.float32) + bqkv_ref[0]   # (TB*S, 3H)

    # ---- per-head attention core ----------------------------------------------
    # Scores/context matmuls inherently have contraction depth hd; the static
    # Python loop over heads (lane slices of the fused projection) issues the
    # same MXU work as a head-batched einsum while keeping all projections
    # lane-dense and avoiding head-major activation relayouts.
    # TODO(synk): flash/KV-tile this block for long sequences (v7x 64 MiB VMEM).
    ctx_heads = []
    for h in range(n_heads):
        qh = qkv[:, h * hd:(h + 1) * hd].reshape(TB, S, hd)
        kh = qkv[:, H + h * hd:H + (h + 1) * hd].reshape(TB, S, hd)
        vh = qkv[:, 2 * H + h * hd:2 * H + (h + 1) * hd].reshape(TB, S, hd)

        energy = jnp.einsum('bqd,bkd->bqk', qh.astype(jnp.bfloat16),
                            kh.astype(jnp.bfloat16),
                            preferred_element_type=jnp.float32)        # (TB,S,S) f32
        energy = energy + bias                                         # additive mask

        m = jnp.max(energy, axis=-1, keepdims=True)
        e = jnp.exp(energy - m)
        denom = jnp.sum(e, axis=-1, keepdims=True)
        attn = e * pl.reciprocal(denom, approx=True)                   # EUP reciprocal

        ctx_heads.append(jnp.einsum('bqk,bkd->bqd', attn.astype(jnp.bfloat16),
                                    vh.astype(jnp.bfloat16),
                                    preferred_element_type=jnp.float32))  # (TB,S,hd)

    # concat over heads -> (TB*S, H); output projection has contraction depth H.
    ctx = jnp.concatenate(ctx_heads, axis=-1).reshape(TB * S, H)
    attn_out = jnp.dot(ctx.astype(jnp.bfloat16), wo_ref[0],
                       preferred_element_type=jnp.float32) + bo_ref[0]

    # ---- residual + LayerNorm 1 (f32 stats) ------------------------------------
    y = x + attn_out
    mu = jnp.mean(y, axis=-1, keepdims=True)
    var = jnp.mean((y - mu) ** 2, axis=-1, keepdims=True)
    y = (y - mu) * jax.lax.rsqrt(var + eps) * ln1_g_ref[0] + ln1_b_ref[0]

    # ---- positionwise feedforward (bf16 matmuls, f32 accumulate) ---------------
    h1 = jnp.dot(y.astype(jnp.bfloat16), w1_ref[0],
                 preferred_element_type=jnp.float32) + b1_ref[0]
    h1 = jnp.maximum(h1, 0.0)
    h2 = jnp.dot(h1.astype(jnp.bfloat16), w2_ref[0],
                 preferred_element_type=jnp.float32) + b2_ref[0]

    # ---- residual + LayerNorm 2 -------------------------------------------------
    z = y + h2
    mu2 = jnp.mean(z, axis=-1, keepdims=True)
    var2 = jnp.mean((z - mu2) ** 2, axis=-1, keepdims=True)
    z = (z - mu2) * jax.lax.rsqrt(var2 + eps) * ln2_g_ref[0] + ln2_b_ref[0]

    # carry to next layer (skip the redundant store on the last layer)
    @pl.when(l < n_layers - 1)
    def _():
        x_sc[...] = z

    @pl.when(l == n_layers - 1)
    def _():
        o_ref[...] = z.reshape(TB, S, H)


# ----------------------------------------------------------------------------
# One-time parameter stacking: per-layer -> (L, ...) arrays, fused lane-dense
# QKV weight with 1/sqrt(head_dim) folded in, bf16 matmul weights, f32 biases.
# Call this ONCE (outside the per-step forward path).
# ----------------------------------------------------------------------------
def build_stacked_params(params, n_heads):
    H = params["tok_emb"].shape[1]
    hd = H // n_heads
    inv_scale = 1.0 / math.sqrt(hd)
    layers = params["layers"]

    def stack(fn):
        return jnp.stack([fn(p) for p in layers], axis=0)

    def qkv_w(p):   # (H, 3H): [Wq/sqrt(hd) | Wk | Wv]
        return jnp.concatenate([p["wq"] * inv_scale, p["wk"], p["wv"]],
                               axis=1).astype(jnp.bfloat16)

    def qkv_b(p):   # (1, 3H)
        return jnp.concatenate([p["bq"] * inv_scale, p["bk"], p["bv"]],
                               axis=1).astype(jnp.float32)

    return {
        "wqkv": stack(qkv_w), "bqkv": stack(qkv_b),
        "wo": stack(lambda p: p["wo"].astype(jnp.bfloat16)),
        "bo": stack(lambda p: p["bo"].astype(jnp.float32)),
        "ln1_g": stack(lambda p: p["ln1_g"]), "ln1_b": stack(lambda p: p["ln1_b"]),
        "w1": stack(lambda p: p["w1"].astype(jnp.bfloat16)),
        "b1": stack(lambda p: p["b1"]),
        "w2": stack(lambda p: p["w2"].astype(jnp.bfloat16)),
        "b2": stack(lambda p: p["b2"]),
        "ln2_g": stack(lambda p: p["ln2_g"]), "ln2_b": stack(lambda p: p["ln2_b"]),
    }


def _pick_batch_tile(batch, max_tb=8):
    tb = min(batch, max_tb)
    while batch % tb:
        tb -= 1
    return tb


# ----------------------------------------------------------------------------
# Wrapper: one pallas_call for the whole encoder stack.
# `stacked` must come from build_stacked_params (computed once, not per call).
# ----------------------------------------------------------------------------
def encoder_forward(src_ids, src_mask, tok_emb, pos_emb, stacked, n_heads):
    H = tok_emb.shape[1]
    assert H % n_heads == 0, "hidden_dim must be divisible by n_heads"
    B, S = src_ids.shape
    L = stacked["wqkv"].shape[0]
    PF = stacked["w1"].shape[-1]

    tb = _pick_batch_tile(B)          # TB sequences per grid step (weights DMA'd
    nb = B // tb                      # once per TB sequences per layer)

    # Embedding gather + scale + positional add: plain-JAX glue (XLA fuses it
    # into the gather); the (B,S,H) activation touches HBM exactly once.
    x = (jnp.take(tok_emb, src_ids, axis=0) * math.sqrt(H)
         + pos_emb[None, :S, :]).astype(jnp.float32)

    # Additive attention bias, computed once (not per head inside the kernel).
    bias = jnp.where(src_mask == 0.0, -1e10, 0.0).astype(jnp.float32)

    def wspec(arr):   # per-layer weight block, prefetched along the layer axis
        tail = arr.shape[1:]
        zeros = (0,) * len(tail)
        return pl.BlockSpec((1,) + tail, lambda bt, l, z=zeros: (l,) + z)

    in_specs = [
        pl.BlockSpec((tb, S, H), lambda bt, l: (bt, 0, 0)),     # embedded input
        pl.BlockSpec((tb, 1, S), lambda bt, l: (bt, 0, 0)),     # additive mask bias
        wspec(stacked["wqkv"]), wspec(stacked["bqkv"]),
        wspec(stacked["wo"]), wspec(stacked["bo"]),
        wspec(stacked["ln1_g"]), wspec(stacked["ln1_b"]),
        wspec(stacked["w1"]), wspec(stacked["b1"]),
        wspec(stacked["w2"]), wspec(stacked["b2"]),
        wspec(stacked["ln2_g"]), wspec(stacked["ln2_b"]),
    ]

    # Rough cost hint so XLA schedules the embedding gather / mask prep well.
    flops = int(2 * B * S * L * (3 * H * H + 2 * S * H + H * H + 2 * H * PF))
    transcendentals = int(B * n_heads * S * S * L)
    weight_bytes = sum(int(v.size) * v.dtype.itemsize for v in stacked.values())
    bytes_accessed = int(2 * B * S * H * 4 + nb * weight_bytes)

    kernel = functools.partial(encoder_stack_kernel, n_heads=n_heads)

    return pl.pallas_call(
        kernel,
        out_shape=jax.ShapeDtypeStruct((B, S, H), jnp.float32),
        grid=(nb, L),
        in_specs=in_specs,
        out_specs=pl.BlockSpec((tb, S, H), lambda bt, l: (bt, 0, 0)),
        scratch_shapes=[pltpu.VMEM((tb * S, H), jnp.float32)],  # cross-layer carry
        compiler_params=pltpu.CompilerParams(
            dimension_semantics=("parallel", "arbitrary"),  # batch tiles -> 2 TCs on v7x
            # Safe across v5e/v6e/v7x; raise toward ~100 MiB on v5e/v6e at real
            # sizes for bigger batch tiles / deeper weight prefetch.
            vmem_limit_bytes=48 * 1024 * 1024),
        cost_estimate=pl.CostEstimate(flops=flops,
                                      transcendentals=transcendentals,
                                      bytes_accessed=bytes_accessed),
    )(x, bias,
      stacked["wqkv"], stacked["bqkv"], stacked["wo"], stacked["bo"],
      stacked["ln1_g"], stacked["ln1_b"],
      stacked["w1"], stacked["b1"], stacked["w2"], stacked["b2"],
      stacked["ln2_g"], stacked["ln2_b"])


# ----------------------------------------------------------------------------
# Deterministic parameter construction (nn.Linear weights pre-transposed to
# (in, out) so kernels compute x @ W + b).
# ----------------------------------------------------------------------------
def init_params(key, vocab, hidden, n_layers, n_heads, pf_dim, max_len):
    def normal(k, shape, scale=0.02):
        return (scale * jax.random.normal(k, shape)).astype(jnp.float32)

    keys = jax.random.split(key, 2 + n_layers)
    params = {
        "tok_emb": normal(keys[0], (vocab, hidden), 1.0),
        "pos_emb": normal(keys[1], (max_len, hidden), 1.0),
        "layers": [],
    }
    for li in range(n_layers):
        lk = jax.random.split(keys[2 + li], 16)
        layer = {
            "wq": normal(lk[0], (hidden, hidden)),
            "bq": normal(lk[1], (1, hidden)),
            "wk": normal(lk[2], (hidden, hidden)),
            "bk": normal(lk[3], (1, hidden)),
            "wv": normal(lk[4], (hidden, hidden)),
            "bv": normal(lk[5], (1, hidden)),
            "wo": normal(lk[6], (hidden, hidden)),
            "bo": normal(lk[7], (1, hidden)),
            "ln1_g": 1.0 + normal(lk[8], (1, hidden)),
            "ln1_b": normal(lk[9], (1, hidden)),
            "w1": normal(lk[10], (hidden, pf_dim)),
            "b1": normal(lk[11], (1, pf_dim)),
            "w2": normal(lk[12], (pf_dim, hidden)),
            "b2": normal(lk[13], (1, hidden)),
            "ln2_g": 1.0 + normal(lk[14], (1, hidden)),
            "ln2_b": normal(lk[15], (1, hidden)),
        }
        params["layers"].append(layer)
    return params


# ----------------------------------------------------------------------------
# Pure-JAX f32 reference (same math as the PyTorch module, dropout = identity)
# ----------------------------------------------------------------------------
def reference_forward(src_ids, src_mask, params, n_heads):
    H = params["tok_emb"].shape[1]
    B, S = src_ids.shape
    hd = H // n_heads
    x = jnp.take(params["tok_emb"], src_ids, axis=0) * math.sqrt(H) \
        + params["pos_emb"][None, :S, :]
    mask4 = src_mask[:, None, :, :]                              # (B,1,1,S)
    for p in params["layers"]:
        q = x @ p["wq"] + p["bq"]
        k = x @ p["wk"] + p["bk"]
        v = x @ p["wv"] + p["bv"]
        q = q.reshape(B, S, n_heads, hd).transpose(0, 2, 1, 3)
        k = k.reshape(B, S, n_heads, hd).transpose(0, 2, 1, 3)
        v = v.reshape(B, S, n_heads, hd).transpose(0, 2, 1, 3)
        energy = jnp.einsum("bhqd,bhkd->bhqk", q, k) / math.sqrt(hd)
        energy = jnp.where(mask4 == 0.0, -1e10, energy)
        attn = jax.nn.softmax(energy, axis=-1)
        a = jnp.einsum("bhqk,bhkd->bhqd", attn, v)
        a = a.transpose(0, 2, 1, 3).reshape(B, S, H)
        a = a @ p["wo"] + p["bo"]
        y = x + a
        mu = y.mean(-1, keepdims=True)
        var = ((y - mu) ** 2).mean(-1, keepdims=True)
        y = (y - mu) / jnp.sqrt(var + 1e-5) * p["ln1_g"] + p["ln1_b"]
        h = jnp.maximum(y @ p["w1"] + p["b1"], 0.0) @ p["w2"] + p["b2"]
        z = y + h
        mu2 = z.mean(-1, keepdims=True)
        var2 = ((z - mu2) ** 2).mean(-1, keepdims=True)
        x = (z - mu2) / jnp.sqrt(var2 + 1e-5) * p["ln2_g"] + p["ln2_b"]
    return x


# ----------------------------------------------------------------------------
if __name__ == "__main__":
    B, S = 2, 8
    VOCAB, HIDDEN, N_LAYERS, N_HEADS, PF_DIM, MAX_LEN = 50, 32, 2, 4, 64, 100

    key = jax.random.PRNGKey(0)
    k_tok, k_params = jax.random.split(key)

    src_ids = jax.random.randint(k_tok, (B, S), 0, VOCAB, dtype=jnp.int32)
    # src_mask: 1 = keep, 0 = padded; mask out last 2 positions of batch 1.
    src_mask = jnp.ones((B, 1, S), jnp.float32)
    src_mask = src_mask.at[1, 0, S - 2:].set(0.0)

    params = init_params(k_params, VOCAB, HIDDEN, N_LAYERS, N_HEADS, PF_DIM, MAX_LEN)

    # One-time weight stacking / layout / bf16 cast (hoisted out of the forward).
    stacked = build_stacked_params(params, N_HEADS)
    stacked = jax.tree_util.tree_map(jax.block_until_ready, stacked)

    out = encoder_forward(src_ids, src_mask, params["tok_emb"], params["pos_emb"],
                          stacked, N_HEADS)
    out = jax.block_until_ready(out)

    ref = reference_forward(src_ids, src_mask, params, N_HEADS)
    assert out.shape == (B, S, HIDDEN)
    # bf16 matmul operands (f32 accumulate) + approx reciprocal -> relaxed tol
    # vs. the pure-f32 reference.
    assert jnp.allclose(out, ref, atol=2e-2, rtol=2e-2), \
        f"max abs diff {jnp.max(jnp.abs(out - ref))}"

    print("KERNEL_OK")
</pallas_src>

<mosaic_0001>
module attributes {stable_mosaic.version = 11 : i64} {
  func.func @encoder_stack_kernel(%arg0: i32, %arg1: i32, %arg2: memref<2x8x32xf32, #tpu.memory_space<vmem>>, %arg3: memref<2x1x8xf32, #tpu.memory_space<vmem>>, %arg4: memref<1x32x96xbf16, #tpu.memory_space<vmem>>, %arg5: memref<1x1x96xf32, #tpu.memory_space<vmem>>, %arg6: memref<1x32x32xbf16, #tpu.memory_space<vmem>>, %arg7: memref<1x1x32xf32, #tpu.memory_space<vmem>>, %arg8: memref<1x1x32xf32, #tpu.memory_space<vmem>>, %arg9: memref<1x1x32xf32, #tpu.memory_space<vmem>>, %arg10: memref<1x32x64xbf16, #tpu.memory_space<vmem>>, %arg11: memref<1x1x64xf32, #tpu.memory_space<vmem>>, %arg12: memref<1x64x32xbf16, #tpu.memory_space<vmem>>, %arg13: memref<1x1x32xf32, #tpu.memory_space<vmem>>, %arg14: memref<1x1x32xf32, #tpu.memory_space<vmem>>, %arg15: memref<1x1x32xf32, #tpu.memory_space<vmem>>, %arg16: memref<2x8x32xf32, #tpu.memory_space<vmem>>, %arg17: memref<16x32xf32, #tpu.memory_space<vmem>>) attributes {dimension_semantics = [#tpu.dimension_semantics<parallel>, #tpu.dimension_semantics<arbitrary>], iteration_bounds = array<i64: 1, 2>, scalar_prefetch = 0 : i64, scratch_operands = 1 : i64, tpu.core_type = #tpu.core_type<tc>, window_params = [{transform_indices = @transform_0, window_bounds = array<i64: 2, 8, 32>}, {transform_indices = @transform_1, window_bounds = array<i64: 2, 1, 8>}, {transform_indices = @transform_2, window_bounds = array<i64: 1, 32, 96>}, {transform_indices = @transform_3, window_bounds = array<i64: 1, 1, 96>}, {transform_indices = @transform_4, window_bounds = array<i64: 1, 32, 32>}, {transform_indices = @transform_5, window_bounds = array<i64: 1, 1, 32>}, {transform_indices = @transform_6, window_bounds = array<i64: 1, 1, 32>}, {transform_indices = @transform_7, window_bounds = array<i64: 1, 1, 32>}, {transform_indices = @transform_8, window_bounds = array<i64: 1, 32, 64>}, {transform_indices = @transform_9, window_bounds = array<i64: 1, 1, 64>}, {transform_indices = @transform_10, window_bounds = array<i64: 1, 64, 32>}, {transform_indices = @transform_11, window_bounds = array<i64: 1, 1, 32>}, {transform_indices = @transform_12, window_bounds = array<i64: 1, 1, 32>}, {transform_indices = @transform_13, window_bounds = array<i64: 1, 1, 32>}, {transform_indices = @transform_14, window_bounds = array<i64: 2, 8, 32>}]} {
    %c0_i32 = arith.constant 0 : i32
    %0 = arith.cmpi eq, %arg1, %c0_i32 : i32
    %1 = arith.extui %0 : i1 to i32
    %c0_i32_0 = arith.constant 0 : i32
    %2 = arith.cmpi ne, %1, %c0_i32_0 : i32
    scf.if %2 {
      %c0_74 = arith.constant 0 : index
      %c0_75 = arith.constant 0 : index
      %c0_76 = arith.constant 0 : index
      %197 = vector.load %arg2[%c0_74, %c0_75, %c0_76] : memref<2x8x32xf32, #tpu.memory_space<vmem>>, vector<2x8x32xf32>
      %198 = vector.shape_cast %197 : vector<2x8x32xf32> to vector<16x32xf32>
      %c0_77 = arith.constant 0 : index
      %c0_78 = arith.constant 0 : index
      %199 = vector.load %arg17[%c0_77, %c0_78] : memref<16x32xf32, #tpu.memory_space<vmem>>, vector<16x32xf32>
      tpu.vector_store %arg17[%c0_77, %c0_78], %198 {strides = array<i32>} : memref<16x32xf32, #tpu.memory_space<vmem>>, vector<16x32xf32>,
    } else {
    }
    %c0 = arith.constant 0 : index
    %c0_1 = arith.constant 0 : index
    %3 = vector.load %arg17[%c0, %c0_1] : memref<16x32xf32, #tpu.memory_space<vmem>>, vector<16x32xf32>
    %c0_2 = arith.constant 0 : index
    %c0_3 = arith.constant 0 : index
    %c0_4 = arith.constant 0 : index
    %4 = vector.load %arg3[%c0_2, %c0_3, %c0_4] : memref<2x1x8xf32, #tpu.memory_space<vmem>>, vector<2x1x8xf32>
    %5 = arith.truncf %3 : vector<16x32xf32> to vector<16x32xbf16>
    %c0_5 = arith.constant 0 : index
    %c0_6 = arith.constant 0 : index
    %c0_7 = arith.constant 0 : index
    %6 = vector.load %arg4[%c0_5, %c0_6, %c0_7] : memref<1x32x96xbf16, #tpu.memory_space<vmem>>, vector<1x32x96xbf16>
    %7 = vector.shape_cast %6 : vector<1x32x96xbf16> to vector<32x96xbf16>
    %cst = arith.constant dense<0.000000e+00> : vector<16x96xf32>
    %8 = tpu.matmul %5, %7, %cst {dimension_numbers = #tpu.dot_dimension_numbers<[1], [0], [0], [1], [0, 0, 1, 1], [], []>} : vector<16x32xbf16>, vector<32x96xbf16>, vector<16x96xf32> -> vector<16x96xf32>
    %c0_8 = arith.constant 0 : index
    %c0_9 = arith.constant 0 : index
    %c0_10 = arith.constant 0 : index
    %9 = vector.load %arg5[%c0_8, %c0_9, %c0_10] : memref<1x1x96xf32, #tpu.memory_space<vmem>>, vector<1x1x96xf32>
    %10 = vector.shape_cast %9 : vector<1x1x96xf32> to vector<1x96xf32>
    %11 = vector.broadcast %10 : vector<1x96xf32> to vector<16x96xf32>
    %12 = arith.addf %8, %11 : vector<16x96xf32>
    %13 = vector.extract_strided_slice %12 {offsets = [0, 0], sizes = [16, 8], strides = [1, 1]} : vector<16x96xf32> to vector<16x8xf32>
    %14 = vector.shape_cast %13 : vector<16x8xf32> to vector<2x8x8xf32>
    %15 = vector.extract_strided_slice %12 {offsets = [0, 32], sizes = [16, 8], strides = [1, 1]} : vector<16x96xf32> to vector<16x8xf32>
    %16 = vector.shape_cast %15 : vector<16x8xf32> to vector<2x8x8xf32>
    %17 = vector.extract_strided_slice %12 {offsets = [0, 64], sizes = [16, 8], strides = [1, 1]} : vector<16x96xf32> to vector<16x8xf32>
    %18 = vector.shape_cast %17 : vector<16x8xf32> to vector<2x8x8xf32>
    %19 = arith.truncf %14 : vector<2x8x8xf32> to vector<2x8x8xbf16>
    %20 = arith.truncf %16 : vector<2x8x8xf32> to vector<2x8x8xbf16>
    "tpu.trace_start"() <{level = 10 : i32, message = "bqd,bkd->bqk"}> : () -> ()
    %cst_11 = arith.constant dense<0.000000e+00> : vector<2x8x8xf32>
    %21 = tpu.matmul %19, %20, %cst_11 {dimension_numbers = #tpu.dot_dimension_numbers<[2], [2], [1], [1], [0, 0, 0, 1, 1, 1], [0], [0]>} : vector<2x8x8xbf16>, vector<2x8x8xbf16>, vector<2x8x8xf32> -> vector<2x8x8xf32>
    "tpu.trace_stop"() : () -> ()
    %22 = vector.broadcast %4 : vector<2x1x8xf32> to vector<2x8x8xf32>
    %23 = arith.addf %21, %22 : vector<2x8x8xf32>
    %cst_12 = arith.constant dense<0xFF800000> : vector<2x8xf32>
    %24 = vector.multi_reduction <maximumf>, %23, %cst_12 [2] : vector<2x8x8xf32> to vector<2x8xf32>
    %25 = vector.shape_cast %24 : vector<2x8xf32> to vector<2x8x1xf32>
    %26 = vector.broadcast %25 : vector<2x8x1xf32> to vector<2x8x8xf32>
    %27 = arith.subf %23, %26 : vector<2x8x8xf32>
    %28 = math.exp %27 : vector<2x8x8xf32>
    %cst_13 = arith.constant dense<0.000000e+00> : vector<2x8xf32>
    %29 = vector.multi_reduction <add>, %28, %cst_13 [2] : vector<2x8x8xf32> to vector<2x8xf32>
    %30 = vector.shape_cast %29 : vector<2x8xf32> to vector<2x8x1xf32>
    %31 = tpu.reciprocal %30 {approx = true} : vector<2x8x1xf32> -> vector<2x8x1xf32>
    %32 = vector.broadcast %31 : vector<2x8x1xf32> to vector<2x8x8xf32>
    %33 = arith.mulf %28, %32 : vector<2x8x8xf32>
    %34 = arith.truncf %33 : vector<2x8x8xf32> to vector<2x8x8xbf16>
    %35 = arith.truncf %18 : vector<2x8x8xf32> to vector<2x8x8xbf16>
    "tpu.trace_start"() <{level = 10 : i32, message = "bqk,bkd->bqd"}> : () -> ()
    %cst_14 = arith.constant dense<0.000000e+00> : vector<2x8x8xf32>
    %36 = tpu.matmul %34, %35, %cst_14 {dimension_numbers = #tpu.dot_dimension_numbers<[2], [1], [1], [2], [0, 0, 0, 1, 1, 2], [0], [0]>} : vector<2x8x8xbf16>, vector<2x8x8xbf16>, vector<2x8x8xf32> -> vector<2x8x8xf32>
    "tpu.trace_stop"() : () -> ()
    %37 = vector.extract_strided_slice %12 {offsets = [0, 8], sizes = [16, 8], strides = [1, 1]} : vector<16x96xf32> to vector<16x8xf32>
    %38 = vector.shape_cast %37 : vector<16x8xf32> to vector<2x8x8xf32>
    %39 = vector.extract_strided_slice %12 {offsets = [0, 40], sizes = [16, 8], strides = [1, 1]} : vector<16x96xf32> to vector<16x8xf32>
    %40 = vector.shape_cast %39 : vector<16x8xf32> to vector<2x8x8xf32>
    %41 = vector.extract_strided_slice %12 {offsets = [0, 72], sizes = [16, 8], strides = [1, 1]} : vector<16x96xf32> to vector<16x8xf32>
    %42 = vector.shape_cast %41 : vector<16x8xf32> to vector<2x8x8xf32>
    %43 = arith.truncf %38 : vector<2x8x8xf32> to vector<2x8x8xbf16>
    %44 = arith.truncf %40 : vector<2x8x8xf32> to vector<2x8x8xbf16>
    "tpu.trace_start"() <{level = 10 : i32, message = "bqd,bkd->bqk"}> : () -> ()
    %cst_15 = arith.constant dense<0.000000e+00> : vector<2x8x8xf32>
    %45 = tpu.matmul %43, %44, %cst_15 {dimension_numbers = #tpu.dot_dimension_numbers<[2], [2], [1], [1], [0, 0, 0, 1, 1, 1], [0], [0]>} : vector<2x8x8xbf16>, vector<2x8x8xbf16>, vector<2x8x8xf32> -> vector<2x8x8xf32>
    "tpu.trace_stop"() : () -> ()
    %46 = vector.broadcast %4 : vector<2x1x8xf32> to vector<2x8x8xf32>
    %47 = arith.addf %45, %46 : vector<2x8x8xf32>
    %cst_16 = arith.constant dense<0xFF800000> : vector<2x8xf32>
    %48 = vector.multi_reduction <maximumf>, %47, %cst_16 [2] : vector<2x8x8xf32> to vector<2x8xf32>
    %49 = vector.shape_cast %48 : vector<2x8xf32> to vector<2x8x1xf32>
    %50 = vector.broadcast %49 : vector<2x8x1xf32> to vector<2x8x8xf32>
    %51 = arith.subf %47, %50 : vector<2x8x8xf32>
    %52 = math.exp %51 : vector<2x8x8xf32>
    %cst_17 = arith.constant dense<0.000000e+00> : vector<2x8xf32>
    %53 = vector.multi_reduction <add>, %52, %cst_17 [2] : vector<2x8x8xf32> to vector<2x8xf32>
    %54 = vector.shape_cast %53 : vector<2x8xf32> to vector<2x8x1xf32>
    %55 = tpu.reciprocal %54 {approx = true} : vector<2x8x1xf32> -> vector<2x8x1xf32>
    %56 = vector.broadcast %55 : vector<2x8x1xf32> to vector<2x8x8xf32>
    %57 = arith.mulf %52, %56 : vector<2x8x8xf32>
    %58 = arith.truncf %57 : vector<2x8x8xf32> to vector<2x8x8xbf16>
    %59 = arith.truncf %42 : vector<2x8x8xf32> to vector<2x8x8xbf16>
    "tpu.trace_start"() <{level = 10 : i32, message = "bqk,bkd->bqd"}> : () -> ()
    %cst_18 = arith.constant dense<0.000000e+00> : vector<2x8x8xf32>
    %60 = tpu.matmul %58, %59, %cst_18 {dimension_numbers = #tpu.dot_dimension_numbers<[2], [1], [1], [2], [0, 0, 0, 1, 1, 2], [0], [0]>} : vector<2x8x8xbf16>, vector<2x8x8xbf16>, vector<2x8x8xf32> -> vector<2x8x8xf32>
    "tpu.trace_stop"() : () -> ()
    %61 = vector.extract_strided_slice %12 {offsets = [0, 16], sizes = [16, 8], strides = [1, 1]} : vector<16x96xf32> to vector<16x8xf32>
    %62 = vector.shape_cast %61 : vector<16x8xf32> to vector<2x8x8xf32>
    %63 = vector.extract_strided_slice %12 {offsets = [0, 48], sizes = [16, 8], strides = [1, 1]} : vector<16x96xf32> to vector<16x8xf32>
    %64 = vector.shape_cast %63 : vector<16x8xf32> to vector<2x8x8xf32>
    %65 = vector.extract_strided_slice %12 {offsets = [0, 80], sizes = [16, 8], strides = [1, 1]} : vector<16x96xf32> to vector<16x8xf32>
    %66 = vector.shape_cast %65 : vector<16x8xf32> to vector<2x8x8xf32>
    %67 = arith.truncf %62 : vector<2x8x8xf32> to vector<2x8x8xbf16>
    %68 = arith.truncf %64 : vector<2x8x8xf32> to vector<2x8x8xbf16>
    "tpu.trace_start"() <{level = 10 : i32, message = "bqd,bkd->bqk"}> : () -> ()
    %cst_19 = arith.constant dense<0.000000e+00> : vector<2x8x8xf32>
    %69 = tpu.matmul %67, %68, %cst_19 {dimension_numbers = #tpu.dot_dimension_numbers<[2], [2], [1], [1], [0, 0, 0, 1, 1, 1], [0], [0]>} : vector<2x8x8xbf16>, vector<2x8x8xbf16>, vector<2x8x8xf32> -> vector<2x8x8xf32>
    "tpu.trace_stop"() : () -> ()
    %70 = vector.broadcast %4 : vector<2x1x8xf32> to vector<2x8x8xf32>
    %71 = arith.addf %69, %70 : vector<2x8x8xf32>
    %cst_20 = arith.constant dense<0xFF800000> : vector<2x8xf32>
    %72 = vector.multi_reduction <maximumf>, %71, %cst_20 [2] : vector<2x8x8xf32> to vector<2x8xf32>
    %73 = vector.shape_cast %72 : vector<2x8xf32> to vector<2x8x1xf32>
    %74 = vector.broadcast %73 : vector<2x8x1xf32> to vector<2x8x8xf32>
    %75 = arith.subf %71, %74 : vector<2x8x8xf32>
    %76 = math.exp %75 : vector<2x8x8xf32>
    %cst_21 = arith.constant dense<0.000000e+00> : vector<2x8xf32>
    %77 = vector.multi_reduction <add>, %76, %cst_21 [2] : vector<2x8x8xf32> to vector<2x8xf32>
    %78 = vector.shape_cast %77 : vector<2x8xf32> to vector<2x8x1xf32>
    %79 = tpu.reciprocal %78 {approx = true} : vector<2x8x1xf32> -> vector<2x8x1xf32>
    %80 = vector.broadcast %79 : vector<2x8x1xf32> to vector<2x8x8xf32>
    %81 = arith.mulf %76, %80 : vector<2x8x8xf32>
    %82 = arith.truncf %81 : vector<2x8x8xf32> to vector<2x8x8xbf16>
    %83 = arith.truncf %66 : vector<2x8x8xf32> to vector<2x8x8xbf16>
    "tpu.trace_start"() <{level = 10 : i32, message = "bqk,bkd->bqd"}> : () -> ()
    %cst_22 = arith.constant dense<0.000000e+00> : vector<2x8x8xf32>
    %84 = tpu.matmul %82, %83, %cst_22 {dimension_numbers = #tpu.dot_dimension_numbers<[2], [1], [1], [2], [0, 0, 0, 1, 1, 2], [0], [0]>} : vector<2x8x8xbf16>, vector<2x8x8xbf16>, vector<2x8x8xf32> -> vector<2x8x8xf32>
    "tpu.trace_stop"() : () -> ()
    %85 = vector.extract_strided_slice %12 {offsets = [0, 24], sizes = [16, 8], strides = [1, 1]} : vector<16x96xf32> to vector<16x8xf32>
    %86 = vector.shape_cast %85 : vector<16x8xf32> to vector<2x8x8xf32>
    %87 = vector.extract_strided_slice %12 {offsets = [0, 56], sizes = [16, 8], strides = [1, 1]} : vector<16x96xf32> to vector<16x8xf32>
    %88 = vector.shape_cast %87 : vector<16x8xf32> to vector<2x8x8xf32>
    %89 = vector.extract_strided_slice %12 {offsets = [0, 88], sizes = [16, 8], strides = [1, 1]} : vector<16x96xf32> to vector<16x8xf32>
    %90 = vector.shape_cast %89 : vector<16x8xf32> to vector<2x8x8xf32>
    %91 = arith.truncf %86 : vector<2x8x8xf32> to vector<2x8x8xbf16>
    %92 = arith.truncf %88 : vector<2x8x8xf32> to vector<2x8x8xbf16>
    "tpu.trace_start"() <{level = 10 : i32, message = "bqd,bkd->bqk"}> : () -> ()
    %cst_23 = arith.constant dense<0.000000e+00> : vector<2x8x8xf32>
    %93 = tpu.matmul %91, %92, %cst_23 {dimension_numbers = #tpu.dot_dimension_numbers<[2], [2], [1], [1], [0, 0, 0, 1, 1, 1], [0], [0]>} : vector<2x8x8xbf16>, vector<2x8x8xbf16>, vector<2x8x8xf32> -> vector<2x8x8xf32>
    "tpu.trace_stop"() : () -> ()
    %94 = vector.broadcast %4 : vector<2x1x8xf32> to vector<2x8x8xf32>
    %95 = arith.addf %93, %94 : vector<2x8x8xf32>
    %cst_24 = arith.constant dense<0xFF800000> : vector<2x8xf32>
    %96 = vector.multi_reduction <maximumf>, %95, %cst_24 [2] : vector<2x8x8xf32> to vector<2x8xf32>
    %97 = vector.shape_cast %96 : vector<2x8xf32> to vector<2x8x1xf32>
    %98 = vector.broadcast %97 : vector<2x8x1xf32> to vector<2x8x8xf32>
    %99 = arith.subf %95, %98 : vector<2x8x8xf32>
    %100 = math.exp %99 : vector<2x8x8xf32>
    %cst_25 = arith.constant dense<0.000000e+00> : vector<2x8xf32>
    %101 = vector.multi_reduction <add>, %100, %cst_25 [2] : vector<2x8x8xf32> to vector<2x8xf32>
    %102 = vector.shape_cast %101 : vector<2x8xf32> to vector<2x8x1xf32>
    %103 = tpu.reciprocal %102 {approx = true} : vector<2x8x1xf32> -> vector<2x8x1xf32>
    %104 = vector.broadcast %103 : vector<2x8x1xf32> to vector<2x8x8xf32>
    %105 = arith.mulf %100, %104 : vector<2x8x8xf32>
    %106 = arith.truncf %105 : vector<2x8x8xf32> to vector<2x8x8xbf16>
    %107 = arith.truncf %90 : vector<2x8x8xf32> to vector<2x8x8xbf16>
    "tpu.trace_start"() <{level = 10 : i32, message = "bqk,bkd->bqd"}> : () -> ()
    %cst_26 = arith.constant dense<0.000000e+00> : vector<2x8x8xf32>
    %108 = tpu.matmul %106, %107, %cst_26 {dimension_numbers = #tpu.dot_dimension_numbers<[2], [1], [1], [2], [0, 0, 0, 1, 1, 2], [0], [0]>} : vector<2x8x8xbf16>, vector<2x8x8xbf16>, vector<2x8x8xf32> -> vector<2x8x8xf32>
    "tpu.trace_stop"() : () -> ()
    %109 = tpu.concatenate %36, %60, %84, %108 in 2 : vector<2x8x8xf32>, vector<2x8x8xf32>, vector<2x8x8xf32>, vector<2x8x8xf32> -> vector<2x8x32xf32>
    %110 = vector.shape_cast %109 : vector<2x8x32xf32> to vector<16x32xf32>
    %111 = arith.truncf %110 : vector<16x32xf32> to vector<16x32xbf16>
    %c0_27 = arith.constant 0 : index
    %c0_28 = arith.constant 0 : index
    %c0_29 = arith.constant 0 : index
    %112 = vector.load %arg6[%c0_27, %c0_28, %c0_29] : memref<1x32x32xbf16, #tpu.memory_space<vmem>>, vector<1x32x32xbf16>
    %113 = vector.shape_cast %112 : vector<1x32x32xbf16> to vector<32x32xbf16>
    %cst_30 = arith.constant dense<0.000000e+00> : vector<16x32xf32>
    %114 = tpu.matmul %111, %113, %cst_30 {dimension_numbers = #tpu.dot_dimension_numbers<[1], [0], [0], [1], [0, 0, 1, 1], [], []>} : vector<16x32xbf16>, vector<32x32xbf16>, vector<16x32xf32> -> vector<16x32xf32>
    %c0_31 = arith.constant 0 : index
    %c0_32 = arith.constant 0 : index
    %c0_33 = arith.constant 0 : index
    %115 = vector.load %arg7[%c0_31, %c0_32, %c0_33] : memref<1x1x32xf32, #tpu.memory_space<vmem>>, vector<1x1x32xf32>
    %116 = vector.shape_cast %115 : vector<1x1x32xf32> to vector<1x32xf32>
    %117 = vector.broadcast %116 : vector<1x32xf32> to vector<16x32xf32>
    %118 = arith.addf %114, %117 : vector<16x32xf32>
    %119 = arith.addf %3, %118 : vector<16x32xf32>
    %cst_34 = arith.constant dense<0.000000e+00> : vector<16xf32>
    %120 = vector.multi_reduction <add>, %119, %cst_34 [1] : vector<16x32xf32> to vector<16xf32>
    %121 = vector.shape_cast %120 : vector<16xf32> to vector<16x1xf32>
    %cst_35 = arith.constant 3.200000e+01 : f32
    %122 = vector.broadcast %cst_35 : f32 to vector<16x1xf32>
    %123 = arith.divf %121, %122 : vector<16x1xf32>
    %124 = vector.broadcast %123 : vector<16x1xf32> to vector<16x32xf32>
    %125 = arith.subf %119, %124 : vector<16x32xf32>
    %126 = arith.mulf %125, %125 : vector<16x32xf32>
    %cst_36 = arith.constant dense<0.000000e+00> : vector<16xf32>
    %127 = vector.multi_reduction <add>, %126, %cst_36 [1] : vector<16x32xf32> to vector<16xf32>
    %128 = vector.shape_cast %127 : vector<16xf32> to vector<16x1xf32>
    %cst_37 = arith.constant 3.200000e+01 : f32
    %129 = vector.broadcast %cst_37 : f32 to vector<16x1xf32>
    %130 = arith.divf %128, %129 : vector<16x1xf32>
    %131 = vector.broadcast %123 : vector<16x1xf32> to vector<16x32xf32>
    %132 = arith.subf %119, %131 : vector<16x32xf32>
    %cst_38 = arith.constant 9.99999974E-6 : f32
    %133 = vector.broadcast %cst_38 : f32 to vector<16x1xf32>
    %134 = arith.addf %130, %133 : vector<16x1xf32>
    %135 = math.rsqrt %134 : vector<16x1xf32>
    %136 = vector.broadcast %135 : vector<16x1xf32> to vector<16x32xf32>
    %137 = arith.mulf %132, %136 : vector<16x32xf32>
    %c0_39 = arith.constant 0 : index
    %c0_40 = arith.constant 0 : index
    %c0_41 = arith.constant 0 : index
    %138 = vector.load %arg8[%c0_39, %c0_40, %c0_41] : memref<1x1x32xf32, #tpu.memory_space<vmem>>, vector<1x1x32xf32>
    %139 = vector.shape_cast %138 : vector<1x1x32xf32> to vector<1x32xf32>
    %140 = vector.broadcast %139 : vector<1x32xf32> to vector<16x32xf32>
    %141 = arith.mulf %137, %140 : vector<16x32xf32>
    %c0_42 = arith.constant 0 : index
    %c0_43 = arith.constant 0 : index
    %c0_44 = arith.constant 0 : index
    %142 = vector.load %arg9[%c0_42, %c0_43, %c0_44] : memref<1x1x32xf32, #tpu.memory_space<vmem>>, vector<1x1x32xf32>
    %143 = vector.shape_cast %142 : vector<1x1x32xf32> to vector<1x32xf32>
    %144 = vector.broadcast %143 : vector<1x32xf32> to vector<16x32xf32>
    %145 = arith.addf %141, %144 : vector<16x32xf32>
    %146 = arith.truncf %145 : vector<16x32xf32> to vector<16x32xbf16>
    %c0_45 = arith.constant 0 : index
    %c0_46 = arith.constant 0 : index
    %c0_47 = arith.constant 0 : index
    %147 = vector.load %arg10[%c0_45, %c0_46, %c0_47] : memref<1x32x64xbf16, #tpu.memory_space<vmem>>, vector<1x32x64xbf16>
    %148 = vector.shape_cast %147 : vector<1x32x64xbf16> to vector<32x64xbf16>
    %cst_48 = arith.constant dense<0.000000e+00> : vector<16x64xf32>
    %149 = tpu.matmul %146, %148, %cst_48 {dimension_numbers = #tpu.dot_dimension_numbers<[1], [0], [0], [1], [0, 0, 1, 1], [], []>} : vector<16x32xbf16>, vector<32x64xbf16>, vector<16x64xf32> -> vector<16x64xf32>
    %c0_49 = arith.constant 0 : index
    %c0_50 = arith.constant 0 : index
    %c0_51 = arith.constant 0 : index
    %150 = vector.load %arg11[%c0_49, %c0_50, %c0_51] : memref<1x1x64xf32, #tpu.memory_space<vmem>>, vector<1x1x64xf32>
    %151 = vector.shape_cast %150 : vector<1x1x64xf32> to vector<1x64xf32>
    %152 = vector.broadcast %151 : vector<1x64xf32> to vector<16x64xf32>
    %153 = arith.addf %149, %152 : vector<16x64xf32>
    %cst_52 = arith.constant 0.000000e+00 : f32
    %154 = vector.broadcast %cst_52 : f32 to vector<16x64xf32>
    %155 = arith.maximumf %153, %154 : vector<16x64xf32>
    %156 = arith.truncf %155 : vector<16x64xf32> to vector<16x64xbf16>
    %c0_53 = arith.constant 0 : index
    %c0_54 = arith.constant 0 : index
    %c0_55 = arith.constant 0 : index
    %157 = vector.load %arg12[%c0_53, %c0_54, %c0_55] : memref<1x64x32xbf16, #tpu.memory_space<vmem>>, vector<1x64x32xbf16>
    %158 = vector.shape_cast %157 : vector<1x64x32xbf16> to vector<64x32xbf16>
    %cst_56 = arith.constant dense<0.000000e+00> : vector<16x32xf32>
    %159 = tpu.matmul %156, %158, %cst_56 {dimension_numbers = #tpu.dot_dimension_numbers<[1], [0], [0], [1], [0, 0, 1, 1], [], []>} : vector<16x64xbf16>, vector<64x32xbf16>, vector<16x32xf32> -> vector<16x32xf32>
    %c0_57 = arith.constant 0 : index
    %c0_58 = arith.constant 0 : index
    %c0_59 = arith.constant 0 : index
    %160 = vector.load %arg13[%c0_57, %c0_58, %c0_59] : memref<1x1x32xf32, #tpu.memory_space<vmem>>, vector<1x1x32xf32>
    %161 = vector.shape_cast %160 : vector<1x1x32xf32> to vector<1x32xf32>
    %162 = vector.broadcast %161 : vector<1x32xf32> to vector<16x32xf32>
    %163 = arith.addf %159, %162 : vector<16x32xf32>
    %164 = arith.addf %145, %163 : vector<16x32xf32>
    %cst_60 = arith.constant dense<0.000000e+00> : vector<16xf32>
    %165 = vector.multi_reduction <add>, %164, %cst_60 [1] : vector<16x32xf32> to vector<16xf32>
    %166 = vector.shape_cast %165 : vector<16xf32> to vector<16x1xf32>
    %cst_61 = arith.constant 3.200000e+01 : f32
    %167 = vector.broadcast %cst_61 : f32 to vector<16x1xf32>
    %168 = arith.divf %166, %167 : vector<16x1xf32>
    %169 = vector.broadcast %168 : vector<16x1xf32> to vector<16x32xf32>
    %170 = arith.subf %164, %169 : vector<16x32xf32>
    %171 = arith.mulf %170, %170 : vector<16x32xf32>
    %cst_62 = arith.constant dense<0.000000e+00> : vector<16xf32>
    %172 = vector.multi_reduction <add>, %171, %cst_62 [1] : vector<16x32xf32> to vector<16xf32>
    %173 = vector.shape_cast %172 : vector<16xf32> to vector<16x1xf32>
    %cst_63 = arith.constant 3.200000e+01 : f32
    %174 = vector.broadcast %cst_63 : f32 to vector<16x1xf32>
    %175 = arith.divf %173, %174 : vector<16x1xf32>
    %176 = vector.broadcast %168 : vector<16x1xf32> to vector<16x32xf32>
    %177 = arith.subf %164, %176 : vector<16x32xf32>
    %cst_64 = arith.constant 9.99999974E-6 : f32
    %178 = vector.broadcast %cst_64 : f32 to vector<16x1xf32>
    %179 = arith.addf %175, %178 : vector<16x1xf32>
    %180 = math.rsqrt %179 : vector<16x1xf32>
    %181 = vector.broadcast %180 : vector<16x1xf32> to vector<16x32xf32>
    %182 = arith.mulf %177, %181 : vector<16x32xf32>
    %c0_65 = arith.constant 0 : index
    %c0_66 = arith.constant 0 : index
    %c0_67 = arith.constant 0 : index
    %183 = vector.load %arg14[%c0_65, %c0_66, %c0_67] : memref<1x1x32xf32, #tpu.memory_space<vmem>>, vector<1x1x32xf32>
    %184 = vector.shape_cast %183 : vector<1x1x32xf32> to vector<1x32xf32>
    %185 = vector.broadcast %184 : vector<1x32xf32> to vector<16x32xf32>
    %186 = arith.mulf %182, %185 : vector<16x32xf32>
    %c0_68 = arith.constant 0 : index
    %c0_69 = arith.constant 0 : index
    %c0_70 = arith.constant 0 : index
    %187 = vector.load %arg15[%c0_68, %c0_69, %c0_70] : memref<1x1x32xf32, #tpu.memory_space<vmem>>, vector<1x1x32xf32>
    %188 = vector.shape_cast %187 : vector<1x1x32xf32> to vector<1x32xf32>
    %189 = vector.broadcast %188 : vector<1x32xf32> to vector<16x32xf32>
    %190 = arith.addf %186, %189 : vector<16x32xf32>
    %c1_i32 = arith.constant 1 : i32
    %191 = arith.cmpi slt, %arg1, %c1_i32 : i32
    %192 = arith.extui %191 : i1 to i32
    %c0_i32_71 = arith.constant 0 : i32
    %193 = arith.cmpi ne, %192, %c0_i32_71 : i32
    scf.if %193 {
      %c0_74 = arith.constant 0 : index
      %c0_75 = arith.constant 0 : index
      %197 = vector.load %arg17[%c0_74, %c0_75] : memref<16x32xf32, #tpu.memory_space<vmem>>, vector<16x32xf32>
      tpu.vector_store %arg17[%c0_74, %c0_75], %190 {strides = array<i32>} : memref<16x32xf32, #tpu.memory_space<vmem>>, vector<16x32xf32>,
    } else {
    }
    %c1_i32_72 = arith.constant 1 : i32
    %194 = arith.cmpi eq, %arg1, %c1_i32_72 : i32
    %195 = arith.extui %194 : i1 to i32
    %c0_i32_73 = arith.constant 0 : i32
    %196 = arith.cmpi ne, %195, %c0_i32_73 : i32
    scf.if %196 {
      %197 = vector.shape_cast %190 : vector<16x32xf32> to vector<2x8x32xf32>
      %c0_74 = arith.constant 0 : index
      %c0_75 = arith.constant 0 : index
      %c0_76 = arith.constant 0 : index
      %198 = vector.load %arg16[%c0_74, %c0_75, %c0_76] : memref<2x8x32xf32, #tpu.memory_space<vmem>>, vector<2x8x32xf32>
      tpu.vector_store %arg16[%c0_74, %c0_75, %c0_76], %197 {strides = array<i32>} : memref<2x8x32xf32, #tpu.memory_space<vmem>>, vector<2x8x32xf32>,
    } else {
    }
    return
  }
  func.func @transform_0(%arg0: i32, %arg1: i32) -> (i32, i32, i32) {
    %c0_i32 = arith.constant 0 : i32
    %c0_i32_0 = arith.constant 0 : i32
    %c0_i32_1 = arith.constant 0 : i32
    return %arg0, %c0_i32, %c0_i32_0 : i32, i32, i32
  }
  func.func @transform_1(%arg0: i32, %arg1: i32) -> (i32, i32, i32) {
    %c0_i32 = arith.constant 0 : i32
    %c0_i32_0 = arith.constant 0 : i32
    %c0_i32_1 = arith.constant 0 : i32
    return %arg0, %c0_i32, %c0_i32_0 : i32, i32, i32
  }
  func.func @transform_2(%arg0: i32, %arg1: i32) -> (i32, i32, i32) {
    %c0_i32 = arith.constant 0 : i32
    %c0_i32_0 = arith.constant 0 : i32
    %c0_i32_1 = arith.constant 0 : i32
    return %arg1, %c0_i32, %c0_i32_0 : i32, i32, i32
  }
  func.func @transform_3(%arg0: i32, %arg1: i32) -> (i32, i32, i32) {
    %c0_i32 = arith.constant 0 : i32
    %c0_i32_0 = arith.constant 0 : i32
    %c0_i32_1 = arith.constant 0 : i32
    return %arg1, %c0_i32, %c0_i32_0 : i32, i32, i32
  }
  func.func @transform_4(%arg0: i32, %arg1: i32) -> (i32, i32, i32) {
    %c0_i32 = arith.constant 0 : i32
    %c0_i32_0 = arith.constant 0 : i32
    %c0_i32_1 = arith.constant 0 : i32
    return %arg1, %c0_i32, %c0_i32_0 : i32, i32, i32
  }
  func.func @transform_5(%arg0: i32, %arg1: i32) -> (i32, i32, i32) {
    %c0_i32 = arith.constant 0 : i32
    %c0_i32_0 = arith.constant 0 : i32
    %c0_i32_1 = arith.constant 0 : i32
    return %arg1, %c0_i32, %c0_i32_0 : i32, i32, i32
  }
  func.func @transform_6(%arg0: i32, %arg1: i32) -> (i32, i32, i32) {
    %c0_i32 = arith.constant 0 : i32
    %c0_i32_0 = arith.constant 0 : i32
    %c0_i32_1 = arith.constant 0 : i32
    return %arg1, %c0_i32, %c0_i32_0 : i32, i32, i32
  }
  func.func @transform_7(%arg0: i32, %arg1: i32) -> (i32, i32, i32) {
    %c0_i32 = arith.constant 0 : i32
    %c0_i32_0 = arith.constant 0 : i32
    %c0_i32_1 = arith.constant 0 : i32
    return %arg1, %c0_i32, %c0_i32_0 : i32, i32, i32
  }
  func.func @transform_8(%arg0: i32, %arg1: i32) -> (i32, i32, i32) {
    %c0_i32 = arith.constant 0 : i32
    %c0_i32_0 = arith.constant 0 : i32
    %c0_i32_1 = arith.constant 0 : i32
    return %arg1, %c0_i32, %c0_i32_0 : i32, i32, i32
  }
  func.func @transform_9(%arg0: i32, %arg1: i32) -> (i32, i32, i32) {
    %c0_i32 = arith.constant 0 : i32
    %c0_i32_0 = arith.constant 0 : i32
    %c0_i32_1 = arith.constant 0 : i32
    return %arg1, %c0_i32, %c0_i32_0 : i32, i32, i32
  }
  func.func @transform_10(%arg0: i32, %arg1: i32) -> (i32, i32, i32) {
    %c0_i32 = arith.constant 0 : i32
    %c0_i32_0 = arith.constant 0 : i32
    %c0_i32_1 = arith.constant 0 : i32
    return %arg1, %c0_i32, %c0_i32_0 : i32, i32, i32
  }
  func.func @transform_11(%arg0: i32, %arg1: i32) -> (i32, i32, i32) {
    %c0_i32 = arith.constant 0 : i32
    %c0_i32_0 = arith.constant 0 : i32
    %c0_i32_1 = arith.constant 0 : i32
    return %arg1, %c0_i32, %c0_i32_0 : i32, i32, i32
  }
  func.func @transform_12(%arg0: i32, %arg1: i32) -> (i32, i32, i32) {
    %c0_i32 = arith.constant 0 : i32
    %c0_i32_0 = arith.constant 0 : i32
    %c0_i32_1 = arith.constant 0 : i32
    return %arg1, %c0_i32, %c0_i32_0 : i32, i32, i32
  }
  func.func @transform_13(%arg0: i32, %arg1: i32) -> (i32, i32, i32) {
    %c0_i32 = arith.constant 0 : i32
    %c0_i32_0 = arith.constant 0 : i32
    %c0_i32_1 = arith.constant 0 : i32
    return %arg1, %c0_i32, %c0_i32_0 : i32, i32, i32
  }
  func.func @transform_14(%arg0: i32, %arg1: i32) -> (i32, i32, i32) {
    %c0_i32 = arith.constant 0 : i32
    %c0_i32_0 = arith.constant 0 : i32
    %c0_i32_1 = arith.constant 0 : i32
    return %arg0, %c0_i32, %c0_i32_0 : i32, i32, i32
  }
}

</mosaic_0001>

<bundles_post_ra>
// kernel: tpu_custom_call.1
= control target key start
LH: loop header
LB: loop body
LE: loop exit
PB: predicated region body
PF: predicated region fallthrough
CT: control target
= control target key end

     0   :  { %s3656_s0 = inlined_call_operand.hbm [shape: f32[2,8,32], index: 0, kind: input, shape index: {}]   ;;  %s3657_s1 = inlined_call_operand.vmem [shape: f32[2,1,8], index: 1, kind: input, shape index: {}]   ;;  %s3658_s2 = inlined_call_operand.vmem [shape: bf16[2,32,96], index: 2, kind: input, shape index: {}]   ;;  %s3659_s3 = inlined_call_operand.vmem [shape: f32[2,1,96], index: 3, kind: input, shape index: {}]   ;;  %s3660_s4 = inlined_call_operand.vmem [shape: bf16[2,32,32], index: 4, kind: input, shape index: {}]   ;;  %s3661_s5 = inlined_call_operand.hbm [shape: f32[2,1,32], index: 5, kind: input, shape index: {}]   ;;  %s3662_s6 = inlined_call_operand.hbm [shape: f32[2,1,32], index: 6, kind: input, shape index: {}]   ;;  %s3663_s7 = inlined_call_operand.hbm [shape: f32[2,1,32], index: 7, kind: input, shape index: {}]   ;;  %s3664_s8 = inlined_call_operand.vmem [shape: bf16[2,32,64], index: 8, kind: input, shape index: {}]   ;;  %s3665_s9 = inlined_call_operand.hbm [shape: f32[2,1,64], index: 9, kind: input, shape index: {}]   ;;  %s3666_s10 = inlined_call_operand.vmem [shape: bf16[2,64,32], index: 10, kind: input, shape index: {}]   ;;  %s3667_s11 = inlined_call_operand.vmem [shape: f32[2,1,32], index: 11, kind: input, shape index: {}]   ;;  %s3668_s12 = inlined_call_operand.vmem [shape: f32[2,1,32], index: 12, kind: input, shape index: {}]   ;;  %s3669_s13 = inlined_call_operand.vmem [shape: f32[2,1,32], index: 13, kind: input, shape index: {}]   ;;  %s3670_s14 = inlined_call_operand.hbm [shape: f32[2,8,32], index: 14, kind: output, shape index: {}]  }
   0x1   :  { %3684 = sst [smem:[#allocation22_spill]] %s3656_s0 }
   0x2   :  { %3685 = sst [smem:[#allocation23_spill]] %s3657_s1 }
   0x3   :  { %3686 = sst [smem:[#allocation24_spill]] %s3658_s2 }
   0x4   :  { %3687 = sst [smem:[#allocation25_spill]] %s3660_s4 }
   0x5   :  { %3688 = sst [smem:[#allocation26_spill]] %s3661_s5 }
   0x6   :  { %3689 = sst [smem:[#allocation27_spill]] %s3663_s7 }
   0x7   :  { %3690 = sst [smem:[#allocation28_spill]] %s3664_s8 }
   0x8   :  { %3691 = sst [smem:[#allocation29_spill]] %s3666_s10 }
   0x9   :  { %3692 = sst [smem:[#allocation30_spill]] %s3667_s11 }
   0xa   :  { %3693 = sst [smem:[#allocation31_spill]] %s3668_s12 }
   0xb   :  { %3694 = sst [smem:[#allocation32_spill]] %s3669_s13 }
   0xc   :  { %3695 = sst [smem:[#allocation33_spill]] %s3670_s14 }
   0xd   :  { %19 = vsyncpa [#allocation4], 0 }
   0xe   :  { %20 = vsyncpa [#allocation7], 0 }
   0xf   :  { %22 = vsyncpa [#allocation7 + $0x1], 0 }
  0x10   :  { %23 = vsyncpa [#allocation10], 0 }
  0x11   :  { %25 = vsyncpa [#allocation10 + $0x1], 0 }
  0x12   :  { %26 = vsyncpa [#allocation5], 0  ;;  %s3090_s29 = smov 0   ;;  %s3092_s30 = smov 0  }
  0x13   :  { %s3094_s15 = smov 0   ;;  %s3096_s16 = smov 0  }
  0x14   :  { %s3098_s17 = smov 0   ;;  %s3100_s18 = smov 0  }
  0x15 LB: > { %3696 = sst [smem:[#allocation17_spill]] %s2976_s15  ;;  %s41_s19 = sadd.s32 1, %s2984_s17  ;;  %s2988_s18 = sphi %s3100_s18, %s32_s18   ;;  %s2984_s17 = sphi %s3098_s17, %s3739_s17   ;;  %s2980_s16 = sphi %s3096_s16, %s3738_s16   ;;  %s2976_s15 = sphi %s3094_s15, %s3737_s15   ;;  %s2972_s30 = sphi %s3092_s30, %s3741_s30   ;;  %s2968_s29 = sphi %s3090_s29, %s3740_s29  }
  0x16   : > { %3697 = sst [smem:[#allocation18_spill]] %s2984_s17  ;;  %s181_s20 = sadd.s32 1, %s2976_s15 }
  0x17   : > { %3698 = sst [smem:[#allocation19_spill]] %s2988_s18  ;;  %p42_p0 = scmp.ge.s32.totalorder %s41_s19, 2 }
  0x18   : > { %p188_p1 = scmp.ne.s32.totalorder %s2976_s15, %s2972_s30  ;;  %p189_p2 = scmp.eq.s32.totalorder %s2988_s18, 0 }
  0x19   : > { %s3743_s19 = smov (%p42_p0, %s41_s19), 0  ;;  %p2614_p4 = scmp.lt.s32.totalorder %s2988_s18, 2 }
  0x1a   : > { %3699 = sst [smem:[#allocation20_spill]] %s3743_s19  ;;  %p190_p3 = por %p189_p2, %p188_p1 }
  0x1b   : > { %s178_s21 = ssub.s32 %s2984_s17, %s3743_s19  ;;  %s3132_s23 = sand.u32 1, %s2976_s15  }
  0x1c   : > { %p179_p5 = scmp.eq.s32.totalorder %s178_s21, 0  ;;  %s3135_s24 = sshll.u32 %s2984_s17, 4 }
  0x1d   : > { %s3701_s5 = sld [smem:[#allocation26_spill]]  ;;  %s501_s19 = scalar_lea.vmem [#allocation6], %s3132_s23 }
  0x1e   : > { %s3138_s25 = scalar_select %p179_p5, %s2976_s15, %s181_s20  }
  0x1f   : > { %s508_s22 = sshll.u32 %s501_s19, 4  ;;  %p3147_p6 = pnand %p2614_p4, %p190_p3  ;;  %s3151_s22 = int_to_ptr.vmem [resolvable:$true] %s508_s22 }
  0x20   : > { %3700 = sst [smem:[#allocation21_spill]] %s3138_s25  ;;  %s3703_s20 = sand.u32 1, %s2988_s18  }
  0x21   : > { %s3702_s21 = scalar_select %p3147_p6, 1, 0 }
  0x22   : > { %s3155_s17 = scalar_lea.sflag [#allocation7], %s3703_s20  ;;  %p3161_p8 = pneg %p3147_p6 }
  0x23   : > { %s3144_s28 = scalar_lea.hbm %s3701_s5, %s3135_s24  ;;  %s2757_s15 = scalar_lea.hbm %s3701_s5, 32 }
  0x24   : > { %s2752_s25 = scalar_lea.hbm %s3144_s28, 16  ;;  %p2758_p11 = scmp.lt.u32.totalorder %s3144_s28, %s3701_s5 }
  0x25   : > { %p2753_p7 = scmp.ne.s32.totalorder %s3144_s28, %s2752_s25  ;;  %p2759_p12 = scmp.lt.u32.totalorder %s2757_s15, %s2752_s25 }
  0x26   : > { %s3704_s26 = scalar_select %p3161_p8, 1, 0 }
  0x27   : > { %p2755_p9 = pnand %p3161_p8, %p2753_p7  ;;  %p2760_p13 = por %p2759_p12, %p2758_p11 }
  0x28   : > { %p2761_p0 = scmp.lt.u32.totalorder %s2752_s25, %s3144_s28 }
  0x29   : > { %p2756_p10 = pneg %p2755_p9 }
  0x2a   : > { %p2762_p1 = por %p2761_p0, %p2760_p13 }
  0x2c   : > { %p2763_p2 = pnand %p2762_p1, %p2756_p10 }
  0x2e   : > { %2766 = shalt.err (!%p2763_p2)
}
  0x2f   : > { %s2767_s20 = scalar_lea.vmem %s3151_s22, 16  ;;  %s2990_s19 = smov [#allocation6]  }
  0x30   : > { %p2768_p3 = scmp.ne.s32.totalorder %s3151_s22, %s2767_s20  ;;  %s2772_s27 = sshll.u32 %s2990_s19, 4  ;;  %s2773_s27 = int_to_ptr.vmem [resolvable:$false] %s2772_s27 }
  0x31   : > { %s2774_s1 = scalar_lea.vmem %s2773_s27, 32  ;;  %p2775_p7 = scmp.lt.s32.totalorder %s3151_s22, %s2773_s27 }
  0x32   : > { %p2770_p4 = pnand %p2768_p3, %p3161_p8  ;;  %p2776_p9 = scmp.lt.s32.totalorder %s2774_s1, %s2767_s20 }
  0x34   : > { %p2771_p5 = pneg %p2770_p4  ;;  %p2777_p11 = por %p2776_p9, %p2775_p7 }
  0x36   : > { %p2778_p12 = pnand %p2777_p11, %p2771_p5 }
  0x38   : > { %2781 = shalt.err (!%p2778_p12)
}
  0x39   : > { %2603 = dma.hbm_to_vmem [thread:$0]  (!%p3147_p6), %s3144_s28, 16, %s3151_s22, %s3155_s17  }
  0x3a   : > { %s3705_s7 = sld [smem:[#allocation27_spill]]  ;;  %s535_s20 = scalar_lea.vmem [#allocation9], %s3132_s23 }
  0x3b   : > { %s542_s19 = sshll.u32 %s535_s20, 4  ;;  %s3706_s27 = sand.u32 1, %s2988_s18   ;;  %s543_s19 = int_to_ptr.vmem [resolvable:$true] %s542_s19 }
  0x3c   : > { %s3194_s1 = scalar_lea.sflag [#allocation10], %s3706_s27 }
  0x40   : > { %s3189_s25 = scalar_lea.hbm %s3705_s7, %s3135_s24  ;;  %s2787_s14 = scalar_lea.hbm %s3705_s7, 32 }
  0x41   : > { %s2782_s5 = scalar_lea.hbm %s3189_s25, 16  ;;  %p2788_p1 = scmp.lt.u32.totalorder %s3189_s25, %s3705_s7 }
  0x42   : > { %p2783_p10 = scmp.ne.s32.totalorder %s3189_s25, %s2782_s5  ;;  %p2789_p2 = scmp.lt.u32.totalorder %s2787_s14, %s2782_s5 }
  0x43   : > { %p2791_p4 = scmp.lt.u32.totalorder %s2782_s5, %s3189_s25 }
  0x44   : > { %p2785_p13 = pnand %p2783_p10, %p3161_p8  ;;  %p2790_p3 = por %p2789_p2, %p2788_p1 }
  0x46   : > { %p2786_p0 = pneg %p2785_p13  ;;  %p2792_p5 = por %p2791_p4, %p2790_p3 }
  0x48   : > { %p2793_p7 = pnand %p2792_p5, %p2786_p0 }
  0x4a   : > { %2796 = shalt.err (!%p2793_p7)
}
  0x4b   : > { %s2797_s20 = scalar_lea.vmem %s543_s19, 16  ;;  %s2991_s27 = smov [#allocation9]  }
  0x4c   : > { %p2798_p9 = scmp.ne.s32.totalorder %s543_s19, %s2797_s20  ;;  %s2802_s12 = sshll.u32 %s2991_s27, 4  ;;  %s2803_s12 = int_to_ptr.vmem [resolvable:$false] %s2802_s12 }
  0x4d   : > { %s2804_s22 = scalar_lea.vmem %s2803_s12, 32  ;;  %p2805_p10 = scmp.lt.s32.totalorder %s543_s19, %s2803_s12 }
  0x4e   : > { %p2800_p11 = pnand %p2798_p9, %p3161_p8  ;;  %p2806_p13 = scmp.lt.s32.totalorder %s2804_s22, %s2797_s20 }
  0x50   : > { %p2801_p12 = pneg %p2800_p11  ;;  %p2807_p6 = por %p2806_p13, %p2805_p10 }
  0x52   : > { %p2808_p1 = pnand %p2807_p6, %p2801_p12 }
  0x54   : > { %2811 = shalt.err (!%p2808_p1)
}
  0x55   : > { %p3707_p2 = scmp.ne.s32.totalorder %s3702_s21, 0  ;;  %s3215_s5 = sadd.s32 4294967295, %s2988_s18  }
  0x56   : > { %p194_p0 = scmp.ne.s32.totalorder %s2972_s30, %s2968_s29  ;;  %p3679_p6 = scmp.eq.s32.totalorder %s3215_s5, 0 }
  0x57   : > { %2609 = dma.hbm_to_vmem [thread:$0]  (!%p3707_p2), %s3189_s25, 16, %s543_s19, %s3194_s1  }
  0x58   : > { %p2333_p3 = scmp.ge.s32.totalorder %s2988_s18, 1  ;;  %p439_p4 = scmp.lt.s32.totalorder %s2988_s18, 3 }
  0x59   : > { %p3224_p5 = por %p3679_p6, %p194_p0  ;;  %s2992_s25 = smov [#allocation3]  }
  0x5a   : > { %p3228_p7 = pnand %p2333_p3, %p439_p4  ;;  %s454_s19 = sshll.u32 %s2992_s25, 4  ;;  %s455_s19 = int_to_ptr.vmem [resolvable:$true] %s454_s19 }
  0x5b   : > { %s3708_s12 = scalar_select %p3224_p5, 1, 0 }
  0x5c   : > { %s3709_s13 = scalar_select %p3228_p7, 1, 0 }
  0x5d   : > { %p2596_p9 = pneg %p3228_p7  ;;  %s3244_s15 = scalar_lea.hbm %s3662_s6, %s3135_s24 }
  0x5e   : > { %s518_s20 = scalar_lea.vmem [#allocation8], %s3132_s23  ;;  %s3711_s0 = sld [smem:[#allocation22_spill]] }
  0x5f   : > { %p3236_p11 = pnand %p2596_p9, %p3679_p6  ;;  %s525_s27 = sshll.u32 %s518_s20, 4  ;;  %s3247_s27 = int_to_ptr.vmem [resolvable:$true] %s525_s27 }
  0x61   : > { %p2814_p10 = pneg %p3236_p11 }
  0x64   : > { %s2812_s7 = scalar_lea.hbm %s3711_s0, 256 }
  0x65   : > { %p2813_p12 = scmp.ne.s32.totalorder %s3711_s0, %s2812_s7  ;;  %p2819_p0 = scmp.lt.u32.totalorder %s2812_s7, %s3711_s0 }
  0x67   : > { %p2815_p13 = pnand %p2814_p10, %p2813_p12 }
  0x69   : > { %p2816_p1 = pneg %p2815_p13 }
  0x6b   : > { %p2821_p3 = pnand %p2819_p0, %p2816_p1 }
  0x6d   : > { %2824 = shalt.err (!%p2821_p3)
}
  0x6e   : > { %s2825_s20 = scalar_lea.vmem %s455_s19, 256  ;;  %p2833_p5 = scmp.lt.s32.totalorder %s455_s19, %s455_s19 }
  0x6f   : > { %p2826_p4 = scmp.ne.s32.totalorder %s455_s19, %s2825_s20  ;;  %p2834_p7 = scmp.lt.s32.totalorder %s2825_s20, %s2825_s20 }
  0x71   : > { %p2828_p9 = pnand %p2826_p4, %p2814_p10  ;;  %p2835_p2 = por %p2834_p7, %p2833_p5 }
  0x73   : > { %p2829_p6 = pneg %p2828_p9 }
  0x75   : > { %p2836_p8 = pnand %p2835_p2, %p2829_p6 }
  0x77   : > { %2839 = shalt.err (!%p2836_p8)
}
  0x78   : > { %s2993_s11 = smov 128   ;;  %s2994_s18 = smov 8  }
  0x79   : > { %2599 = dma.hbm_to_vmem [thread:$0]  (!%p3236_p11), %s3711_s0, 256, %s455_s19, [#allocation4], %s2993_s11, %s2993_s11, %s2994_s18  }
  0x7a   : > { %s2840_s25 = scalar_lea.hbm %s3244_s15, 16  ;;  %p3712_p10 = scmp.ne.s32.totalorder %s3704_s26, 0 }
  0x7b   : > { %p2841_p12 = scmp.ne.s32.totalorder %s3244_s15, %s2840_s25  ;;  %s2845_s20 = scalar_lea.hbm %s3662_s6, 32 }
  0x7c   : > { %p2846_p8 = scmp.lt.u32.totalorder %s3244_s15, %s3662_s6  ;;  %p2847_p2 = scmp.lt.u32.totalorder %s2845_s20, %s2840_s25 }
  0x7d   : > { %p2843_p13 = pnand %p2841_p12, %p3712_p10  ;;  %p2849_p7 = scmp.lt.u32.totalorder %s2840_s25, %s3244_s15 }
  0x7e   : > { %p2848_p6 = por %p2847_p2, %p2846_p8 }
  0x7f   : > { %p2844_p5 = pneg %p2843_p13 }
  0x80   : > { %p2850_p1 = por %p2849_p7, %p2848_p6 }
  0x82   : > { %p2851_p0 = pnand %p2850_p1, %p2844_p5 }
  0x84   : > { %2854 = shalt.err (!%p2851_p0)
}
  0x85   : > { %s2855_s19 = scalar_lea.vmem %s3247_s27, 16  ;;  %s2995_s29 = smov [#allocation8]  }
  0x86   : > { %p2856_p11 = scmp.ne.s32.totalorder %s3247_s27, %s2855_s19  ;;  %s2860_s11 = sshll.u32 %s2995_s29, 4  ;;  %s2861_s11 = int_to_ptr.vmem [resolvable:$false] %s2860_s11 }
  0x87   : > { %s2862_s8 = scalar_lea.vmem %s2861_s11, 32  ;;  %p2863_p9 = scmp.lt.s32.totalorder %s3247_s27, %s2861_s11 }
  0x88   : > { %p2858_p3 = pnand %p2856_p11, %p3712_p10  ;;  %p2864_p12 = scmp.lt.s32.totalorder %s2862_s8, %s2855_s19 }
  0x8a   : > { %p2859_p4 = pneg %p2858_p3  ;;  %p2865_p13 = por %p2864_p12, %p2863_p9 }
  0x8c   : > { %p2866_p8 = pnand %p2865_p13, %p2859_p4 }
  0x8e   : > { %2869 = shalt.err (!%p2866_p8)
}
  0x8f   : > { %p3713_p5 = scmp.ne.s32.totalorder %s3702_s21, 0  ;;  %s3291_s7 = scalar_lea.hbm %s3665_s9, %s3135_s24 }
  0x90   : > { %s560_s22 = scalar_lea.vmem [#allocation11], %s3132_s23  ;;  %s2870_s28 = scalar_lea.hbm %s3291_s7, 16 }
  0x91   : > { %2606 = dma.hbm_to_vmem [thread:$0]  (!%p3713_p5), %s3244_s15, 16, %s3247_s27, %s3155_s17  }
  0x92   : > { %s567_s25 = sshll.u32 %s560_s22, 4  ;;  %p2871_p2 = scmp.ne.s32.totalorder %s3291_s7, %s2870_s28  ;;  %s568_s25 = int_to_ptr.vmem [resolvable:$true] %s567_s25 }
  0x93   : > { %s2875_s17 = scalar_lea.hbm %s3665_s9, 32  ;;  %p2876_p1 = scmp.lt.u32.totalorder %s3291_s7, %s3665_s9 }
  0x94   : > { %p2873_p6 = pnand %p2871_p2, %p3712_p10  ;;  %p2877_p0 = scmp.lt.u32.totalorder %s2875_s17, %s2870_s28 }
  0x95   : > { %p2879_p3 = scmp.lt.u32.totalorder %s2870_s28, %s3291_s7 }
  0x96   : > { %p2874_p7 = pneg %p2873_p6  ;;  %p2878_p11 = por %p2877_p0, %p2876_p1 }
  0x98   : > { %p2880_p4 = por %p2879_p3, %p2878_p11 }
  0x9a   : > { %p2881_p9 = pnand %p2880_p4, %p2874_p7 }
  0x9c   : > { %2884 = shalt.err (!%p2881_p9)
}
  0x9d   : > { %s2885_s23 = scalar_lea.vmem %s568_s25, 16  ;;  %s2996_s24 = smov [#allocation11]  }
  0x9e   : > { %p2886_p12 = scmp.ne.s32.totalorder %s568_s25, %s2885_s23  ;;  %s2890_s19 = sshll.u32 %s2996_s24, 4  ;;  %s2891_s19 = int_to_ptr.vmem [resolvable:$false] %s2890_s19 }
  0x9f   : > { %s2892_s29 = scalar_lea.vmem %s2891_s19, 32  ;;  %p2893_p2 = scmp.lt.s32.totalorder %s568_s25, %s2891_s19 }
  0xa0   : > { %p2888_p13 = pnand %p2886_p12, %p3712_p10  ;;  %p2894_p6 = scmp.lt.s32.totalorder %s2892_s29, %s2885_s23 }
  0xa2   : > { %p2889_p8 = pneg %p2888_p13  ;;  %p2895_p5 = por %p2894_p6, %p2893_p2 }
  0xa4   : > { %p2896_p0 = pnand %p2895_p5, %p2889_p8 }
  0xa6   : > { %2899 = shalt.err (!%p2896_p0)
}
  0xa7   : > { %p3714_p1 = scmp.ne.s32.totalorder %s3702_s21, 0  ;;  %p3715_p7 = scmp.ne.s32.totalorder %s3709_s13, 0 }
  0xa8   : > { %p3716_p10 = scmp.eq.s32.totalorder (!%p3715_p7), %s3215_s5, 0 }
  0xa9   : > { %2612 = dma.hbm_to_vmem [thread:$0]  (!%p3714_p1), %s3291_s7, 16, %s568_s25, %s3194_s1  }
  0xaa   : > { %602 = sbr.rel (%p3715_p7) target bundleno = 4357 (0x1105), region = 76 }
  0xb1   : > { %2951 = dma.done.wait (%p3716_p10), [#allocation4], 256   ;;  %p3717_p11 = pmov %p3716_p10 }
  0xb2   : > { %s608_s26 = sand.u32 1, %s3215_s5   ;;  %s3320_s11 = sand.u32 1, %s2972_s30  }
  0xb3   : > { %2953 = vsyncadd (%p3717_p11), [#allocation4], 4294967040  ;;  %s609_s21 = scalar_lea.sflag [#allocation7], %s608_s26  ;;  %p3718_p5 = scmp.ne.s32.totalorder %s3708_s12, 0 }
  0xb5   : > { %2955 = dma.done.wait (%p3718_p5), %s609_s21, 32  }
  0xb6   : > { %2957 = vsyncadd (%p3718_p5), %s609_s21, 4294967264  ;;  %s625_s13 = scalar_lea.sflag [#allocation10], %s608_s26 }
  0xb7   : > { %2959 = dma.done.wait (%p3718_p5), %s625_s13, 32  }
  0xb8   : > { %2961 = vsyncadd (%p3718_p5), %s625_s13, 4294967264  ;;  %p728_p3 = scmp.lt.s32.totalorder %s2980_s16, 1  ;;  %s3719_s2 = sld [smem:[#allocation24_spill]] }
  0xb9   : > { %s3720_s4 = sld [smem:[#allocation25_spill]]  ;;  %s3721_s19 = sld [smem:[#allocation28_spill]] }
  0xba   : > { %s3335_s18 = scalar_select %p728_p3, %s2980_s16, 1 }
  0xbb   : > { %s3722_s10 = sld [smem:[#allocation29_spill]]  ;;  %s3723_s14 = sld [smem:[#allocation30_spill]] }
  0xbc   : > { %s2398_s7 = sshll.u32 %s3335_s18, 4  ;;  %s2401_s26 = sshll.u32 %s3335_s18, 5 }
  0xbd   : > { %s3724_s17 = sld [smem:[#allocation31_spill]]  ;;  %p2351_p4 = scmp.ne.s32.totalorder %s2980_s16, 0 }
  0xbe   : > { %s732_s20 = scalar_lea.vmem %s3719_s2, %s2398_s7  ;;  %v766_v0 = vld [vmem:[#allocation3] sm:$0xff] (!%p2351_p4)  ;;  %vm768_vm0 = vcmask (!%p2351_p4), 261120   ;;  %v767_v1 = vld [vmem:[#allocation3 + $0x8] sm:$0xff] (!%p2351_p4) }
  0xbf   : > { %s3348_s27 = scalar_lea.vmem %s3720_s4, %s2398_s7  ;;  %s3353_s29 = scalar_lea.vmem %s3721_s19, %s2398_s7  ;;  %769 = vst.msk [vmem:[#allocation2] sm:$0xff] (!%p2351_p4), %vm768_vm0, %v766_v0  ;;  %770 = vst.msk [vmem:[#allocation2 + $0x8] sm:$0xff] (!%p2351_p4), %vm768_vm0, %v767_v1 }
  0xc0   : > { %s3725_s4 = sld [smem:[#allocation32_spill]]  ;;  %s635_s7 = scalar_lea.vmem [#allocation11], %s3320_s11 }
  0xc1   : > { %s3359_s22 = scalar_lea.vmem %s3722_s10, %s2401_s26  ;;  %s753_s12 = scalar_lea.vmem %s3723_s14, %s3335_s18 }
  0xc2   : > { %765 = sbr.rel (%p2351_p4) target bundleno = 201 (0xc9), region = 100 }
  0xc3   : > { %s756_s15 = scalar_lea.vmem %s3724_s17, %s3335_s18 }
  0xc6   : > { %s759_s23 = scalar_lea.vmem %s3725_s4, %s3335_s18 }
  0xc9 PF: > { %v2702_v2 = vld [vmem:[%s732_s20] sm:$0xff]   ;;  %v2997_v3 = vmov 0.0   ;;  %v2703_v4 = vld [vmem:[%s732_s20 + $0x8] sm:$0xff]   ;;  %vm2998_vm1 = vmmov 0   ;;  %vm799_vm2 = vcmask 261120   ;;  %s3726_s4 = scalar_lea.vmem %s3659_s3, %s3335_s18  ;;  %s2999_s8 = smov 96  }
  0xca   : > { %2448 = vmatprep.subr.bf16.mxu0 %v2997_v3  ;;  %2456 = vmatprep.subr.bf16.mxu1 %v2997_v3  ;;  %v3379_v5 = vld [vmem:[#allocation2] sm:$0xff]  ;;  %v3381_v6 = vld [vmem:[#allocation2 + $0x8] sm:$0xff]  ;;  %vm861_vm3 = vcmask 64512   ;;  %s3727_s28 = sld [smem:[#allocation23_spill]]  ;;  %s3000_s19 = smov 64   ;;  %vm986_vm4 = vcmask 1043456  }
  0xcb   : > { %2449 = vmatpush3.bf16.msra.mxu0 %v2702_v2  ;;  %2452 = vmatprep.mubr.msk.bf16.mxu0 %vm2998_vm1, %v2997_v3  ;;  %v775_v7 = vpack.c.bf16 %v3381_v6, %v3379_v5  ;;  %v2352_v8 = vld [vmem:[%s3726_s4] ss:$0 sm:$0xff]  ;;  %s3001_s26 = smov 88   ;;  %s3002_s21 = smov 120   ;;  %vm1764_vm5 = vcmask 130048   ;;  %vm1767_vm6 = vcmask 195584  }
  0xcc   : > { %2450 = vmatprep.subr.bf16.mxu0 %v2997_v3  ;;  %2458 = vmatprep.mubr.msk.bf16.mxu1 %vm2998_vm1, %v2997_v3  ;;  %s3003_s13 = smov 56   ;;  %s3004_s25 = smov 80   ;;  %vm1995_vm7 = vcmask 523264  }
  0xcd   : > { %s3005_s14 = smov 112   ;;  %s3006_s17 = smov 48  }
  0xce   : > { %s3007_s0 = smov 72   ;;  %s3008_s2 = smov 104  }
  0xcf   : > { %2451 = vmatpush3.bf16.msra.mxu0 %v2703_v4  ;;  %s3009_s4 = smov 40   ;;  %s3011_s1 = smov 16  }
  0xd0   : > { %2462 = vmatprep.subr.bf16.mxu0 %v2997_v3  ;;  %v3418_v21 = vld [vmem:[%s3727_s28] ss:$0 sm:$0xff]  ;;  %v3424_v26 = vld [vmem:[%s3727_s28 + $0x1] ss:$0 sm:$0xff]  ;;  %s3012_s10 = smov 24   ;;  %s3730_s20 = scalar_lea.vmem [#allocation9], %s3320_s11 }
  0xd1   : > { %p2392_p9 = scmp.ge.s32.totalorder %s2980_s16, 1 }
  0xd2   : > { %2453 = vmatmul.mubr.msk.bf16.vlgmr.msra.gmra.mrb[0].mxu0 %vm799_vm2, %v775_v7 }
  0xd3   : > { %2464 = vmatprep.mubr.msk.bf16.mxu0 %vm2998_vm1, %v2997_v3 }
 0x1a5   : > { %v837_v9 = vpop.f32.mrb[0].mxu0 }
 0x1a6   : > { %v838_v10 = vadd.f32 %v2352_v8, %v837_v9  ;;  %v2454_v11 = vpop.f32.mrb[1].mxu0 }
 0x1a7   : > { %v840_v12 = vpop.f32.mrb[2].mxu0 }
 0x1a8   : > { %v3397_v13 = vpack.c.bf16 %v838_v10, %v838_v10  ;;  %v841_v14 = vadd.f32 %v2352_v8, %v840_v12  ;;  %v2455_v15 = vpop.f32.mrb[3].mxu0 }
 0x1aa   : > { %859 = vrot.lane.b32.xlu0 %v3397_v13, %s2999_s8  ;;  %v3400_v16 = vpack.c.bf16 %v841_v14, %v841_v14 }
 0x1ae   : > { %909 = vrot.lane.b32.xlu0 %v3400_v16, %s2999_s8  ;;  %s3010_s8 = smov 8  }
 0x21c   : > { %v860_v17 = vpop.permute.xlu0 %859 }
 0x21d   : > { %v866_v18 = vsel %vm861_vm3, %v860_v17, 0 }
 0x21e   : > { %2457 = vmatpush3.bf16.xpose.msra.mxu1 %v866_v18 }
 0x21f   : > { %2468 = vmatprep.subr.bf16.mxu1 %v2997_v3 }
 0x220   : > { %v910_v19 = vpop.permute.xlu0 %909 }
 0x221   : > { %v915_v20 = vsel %vm861_vm3, %v910_v19, 0 }
 0x222   : > { %2463 = vmatpush3.bf16.xpose.msra.mxu0 %v915_v20 }
 0x223   : > { %2474 = vmatprep.subr.bf16.mxu0 %v2997_v3 }
 0x225   : > { %2459 = vmatmul.mubr.msk.bf16.vlgmr.msra.gmra.mrb[0].mxu1 %vm861_vm3, %v3397_v13 }
 0x226   : > { %2470 = vmatprep.mubr.msk.bf16.mxu1 %vm2998_vm1, %v2997_v3 }
 0x229   : > { %2465 = vmatmul.mubr.msk.bf16.vlgmr.msra.gmra.mrb[4].mxu0 %vm861_vm3, %v3400_v16 }
 0x22a   : > { %2476 = vmatprep.mubr.msk.bf16.mxu0 %vm2998_vm1, %v2997_v3 }
 0x2f8   : > { %v902_v22 = vpop.f32.mrb[0].mxu1 }
 0x2f9   : > { %v903_v23 = vadd.f32 %v3418_v21, %v902_v22  ;;  %v2460_v24 = vpop.f32.mrb[1].mxu1 }
 0x2fa   : > { %v905_v25 = vpop.f32.mrb[2].mxu1 }
 0x2fb   : > { %v2461_v27 = vpop.f32.mrb[3].mxu1  ;;  %v957_v28 = vsel %vm861_vm3, %v903_v23, -inf }
 0x2fc   : > { %958 = vmax.xlane.f32.xlu1 %v957_v28  ;;  %v951_v29 = vpop.f32.mrb[4].mxu0 }
 0x2fd   : > { %v952_v30 = vadd.f32 %v3424_v26, %v951_v29  ;;  %v2466_v31 = vpop.f32.mrb[5].mxu0 }
 0x2fe   : > { %v954_v32 = vpop.f32.mrb[6].mxu0 }
 0x2ff   : > { %v2467_v33 = vpop.f32.mrb[7].mxu0  ;;  %v960_v34 = vsel %vm861_vm3, %v952_v30, -inf }
 0x300   : > { %961 = vmax.xlane.f32.xlu1 %v960_v34 }
 0x311   : > { %981 = vrot.lane.b32.xlu1 %v3397_v13, %s3000_s19 }
 0x315   : > { %1030 = vrot.lane.b32.xlu1 %v3400_v16, %s3000_s19 }
 0x319   : > { %1080 = vrot.lane.b32.xlu1 %v3397_v13, %s3001_s26 }
 0x389   : > { %v959_v35 = vpop.xlane.xlu1 %958 }
 0x38a   : > { %v963_v36 = vsub.f32 %v903_v23, %v959_v35 }
 0x38c   : > { %v965_v37 = vmul.f32 1.442695, %v963_v36 }
 0x38d   : > { %v962_v38 = vpop.xlane.xlu1 %961 }
 0x38e   : > { %2712 = vpow2.f32 %v965_v37  ;;  %v964_v39 = vsub.f32 %v952_v30, %v962_v38 }
 0x390   : > { %v967_v40 = vmul.f32 1.442695, %v964_v39 }
 0x391   : > { %v982_v41 = vpop.permute.xlu1 %981 }
 0x392   : > { %2714 = vpow2.f32 %v967_v40  ;;  %v988_v42 = vsel %vm986_vm4, %v982_v41, 0 }
 0x393   : > { %2469 = vmatpush3.bf16.msra.mxu1 %v988_v42 }
 0x394   : > { %2480 = vmatprep.subr.bf16.mxu1 %v2997_v3 }
 0x395   : > { %v1031_v43 = vpop.permute.xlu1 %1030 }
 0x396   : > { %v1036_v44 = vsel %vm986_vm4, %v1031_v43, 0 }
 0x397   : > { %2475 = vmatpush3.bf16.msra.mxu0 %v1036_v44 }
 0x398   : > { %v2713_v45 = vpop.eup %2712  ;;  %2486 = vmatprep.subr.bf16.mxu0 %v2997_v3 }
 0x399   : > { %v969_v46 = vsel %vm861_vm3, %v2713_v45, 0.0  ;;  %v1081_v49 = vpop.permute.xlu1 %1080 }
 0x39a   : > { %970 = vadd.xlane.f32.xlu0 %v969_v46  ;;  %v1086_v56 = vsel %vm861_vm3, %v1081_v49, 0 }
 0x39c   : > { %v2715_v47 = vpop.eup %2714 }
 0x39d   : > { %v972_v48 = vsel %vm861_vm3, %v2715_v47, 0.0 }
 0x39e   : > { %973 = vadd.xlane.f32.xlu1 %v972_v48 }
 0x3af   : > { %1130 = vrot.lane.b32.xlu1 %v3400_v16, %s3001_s26 }
 0x3b0   : > { %1078 = vrot.lane.b32.xlu0 %v3397_v13, %s3002_s21 }
 0x3b3   : > { %1128 = vrot.lane.b32.xlu1 %v3400_v16, %s3002_s21 }
 0x427   : > { %v971_v50 = vpop.xlane.xlu0 %970 }
 0x428   : > { %2716 = vrcp.f32 %v971_v50 }
 0x42b   : > { %v974_v51 = vpop.xlane.xlu1 %973  ;;  %v1079_v61 = vpop.permute.xlu0 %1078 }
 0x42c   : > { %2718 = vrcp.f32 %v974_v51 }
 0x42f   : > { %v1131_v58 = vpop.permute.xlu1 %1130 }
 0x430   : > { %v1136_v60 = vsel %vm861_vm3, %v1131_v58, 0 }
 0x432   : > { %v2717_v52 = vpop.eup %2716 }
 0x433   : > { %v977_v53 = vmul.f32 %v2717_v52, %v2713_v45  ;;  %v1129_v62 = vpop.permute.xlu1 %1128 }
 0x435   : > { %v979_v54 = vpack.c.bf16 %v977_v53, %v977_v53 }
 0x436   : > { %v2719_v55 = vpop.eup %2718 }
 0x437   : > { %v978_v57 = vmul.f32 %v2719_v55, %v2715_v47  ;;  %2471 = vmatmul.mubr.msk.bf16.vlgmr.msra.gmra.mrb[4].mxu1 %vm861_vm3, %v979_v54 }
 0x438   : > { %2481 = vmatpush3.bf16.xpose.msra.mxu1 %v1086_v56  ;;  %2482 = vmatprep.mubr.msk.bf16.mxu1 %vm2998_vm1, %v2997_v3 }
 0x439   : > { %v980_v59 = vpack.c.bf16 %v978_v57, %v978_v57  ;;  %2492 = vmatprep.subr.bf16.mxu1 %v2997_v3 }
 0x43b   : > { %2477 = vmatmul.mubr.msk.bf16.vlgmr.msra.gmra.mrb[8].mxu0 %vm861_vm3, %v980_v59 }
 0x43c   : > { %2487 = vmatpush3.bf16.xpose.msra.mxu0 %v1136_v60  ;;  %2488 = vmatprep.mubr.msk.bf16.mxu0 %vm2998_vm1, %v2997_v3 }
 0x43d   : > { %2498 = vmatprep.subr.bf16.mxu0 %v2997_v3 }
 0x43f   : > { %2483 = vmatmul.mubr.msk.bf16.vlgmr.msra.gmra.mrb[8].mxu1 %vm861_vm3, %v1079_v61 }
 0x440   : > { %2494 = vmatprep.mubr.msk.bf16.mxu1 %vm2998_vm1, %v2997_v3 }
 0x443   : > { %2489 = vmatmul.mubr.msk.bf16.vlgmr.msra.gmra.mrb[12].mxu0 %vm861_vm3, %v1129_v62 }
 0x444   : > { %2500 = vmatprep.mubr.msk.bf16.mxu0 %vm2998_vm1, %v2997_v3 }
 0x50a   : > { %v3457_v63 = vpop.f32.mrb[4].mxu1 }
 0x50b   : > { %v2472_v0 = vpop.f32.mrb[5].mxu1 }
 0x50c   : > { %v1027_v1 = vpop.f32.mrb[6].mxu1 }
 0x50d   : > { %v2473_v2 = vpop.f32.mrb[7].mxu1 }
 0x50e   : > { %v3459_v4 = vpop.f32.mrb[8].mxu0 }
 0x50f   : > { %v2478_v7 = vpop.f32.mrb[9].mxu0 }
 0x510   : > { %v1075_v8 = vpop.f32.mrb[10].mxu0 }
 0x511   : > { %v2479_v9 = vpop.f32.mrb[11].mxu0 }
 0x512   : > { %v1122_v10 = vpop.f32.mrb[8].mxu1 }
 0x513   : > { %v1123_v11 = vadd.f32 %v3418_v21, %v1122_v10  ;;  %v2484_v12 = vpop.f32.mrb[9].mxu1 }
 0x514   : > { %v1125_v14 = vpop.f32.mrb[10].mxu1 }
 0x515   : > { %v2485_v15 = vpop.f32.mrb[11].mxu1  ;;  %v1178_v17 = vsel %vm861_vm3, %v1123_v11, -inf }
 0x516   : > { %1179 = vmax.xlane.f32.xlu1 %v1178_v17  ;;  %v1172_v18 = vpop.f32.mrb[12].mxu0 }
 0x517   : > { %v1173_v19 = vadd.f32 %v3424_v26, %v1172_v18  ;;  %v2490_v20 = vpop.f32.mrb[13].mxu0 }
 0x518   : > { %v1175_v22 = vpop.f32.mrb[14].mxu0 }
 0x519   : > { %v2491_v23 = vpop.f32.mrb[15].mxu0  ;;  %v1181_v24 = vsel %vm861_vm3, %v1173_v19, -inf }
 0x51a   : > { %1182 = vmax.xlane.f32.xlu0 %v1181_v24 }
 0x527   : > { %1202 = vrot.lane.b32.xlu1 %v3397_v13, %s3003_s13 }
 0x52b   : > { %1300 = vrot.lane.b32.xlu1 %v3397_v13, %s3004_s25 }
 0x530   : > { %1250 = vrot.lane.b32.xlu0 %v3400_v16, %s3003_s13 }
 0x534   : > { %1298 = vrot.lane.b32.xlu0 %v3397_v13, %s3005_s14 }
 0x5a3   : > { %v1180_v25 = vpop.xlane.xlu1 %1179 }
 0x5a4   : > { %v1184_v27 = vsub.f32 %v1123_v11, %v1180_v25 }
 0x5a6   : > { %v1186_v28 = vmul.f32 1.442695, %v1184_v27 }
 0x5a7   : > { %v1203_v29 = vpop.permute.xlu1 %1202  ;;  %v1183_v30 = vpop.xlane.xlu0 %1182 }
 0x5a8   : > { %2720 = vpow2.f32 %v1186_v28  ;;  %v1208_v31 = vsel %vm986_vm4, %v1203_v29, 0  ;;  %v1185_v32 = vsub.f32 %v1173_v19, %v1183_v30 }
 0x5a9   : > { %2493 = vmatpush3.bf16.msra.mxu1 %v1208_v31 }
 0x5aa   : > { %v1188_v33 = vmul.f32 1.442695, %v1185_v32  ;;  %2504 = vmatprep.subr.bf16.mxu1 %v2997_v3 }
 0x5ab   : > { %v1251_v34 = vpop.permute.xlu0 %1250  ;;  %v1301_v40 = vpop.permute.xlu1 %1300 }
 0x5ac   : > { %2722 = vpow2.f32 %v1188_v33  ;;  %v1256_v35 = vsel %vm986_vm4, %v1251_v34, 0  ;;  %v1306_v47 = vsel %vm861_vm3, %v1301_v40, 0 }
 0x5ad   : > { %2499 = vmatpush3.bf16.msra.mxu0 %v1256_v35 }
 0x5ae   : > { %2510 = vmatprep.subr.bf16.mxu0 %v2997_v3 }
 0x5af   : > { %v1299_v52 = vpop.permute.xlu0 %1298 }
 0x5b2   : > { %v2721_v36 = vpop.eup %2720 }
 0x5b3   : > { %v1190_v37 = vsel %vm861_vm3, %v2721_v36, 0.0 }
 0x5b4   : > { %1191 = vadd.xlane.f32.xlu1 %v1190_v37 }
 0x5b6   : > { %v2723_v38 = vpop.eup %2722 }
 0x5b7   : > { %v1193_v39 = vsel %vm861_vm3, %v2723_v38, 0.0 }
 0x5b8   : > { %1194 = vadd.xlane.f32.xlu1 %v1193_v39 }
 0x5c9   : > { %1350 = vrot.lane.b32.xlu1 %v3400_v16, %s3004_s25 }
 0x5cd   : > { %1348 = vrot.lane.b32.xlu1 %v3400_v16, %s3005_s14 }
 0x641   : > { %v1192_v41 = vpop.xlane.xlu1 %1191 }
 0x642   : > { %2724 = vrcp.f32 %v1192_v41 }
 0x645   : > { %v1195_v42 = vpop.xlane.xlu1 %1194 }
 0x646   : > { %2726 = vrcp.f32 %v1195_v42 }
 0x649   : > { %v1351_v49 = vpop.permute.xlu1 %1350 }
 0x64a   : > { %v1356_v51 = vsel %vm861_vm3, %v1351_v49, 0 }
 0x64c   : > { %v2725_v43 = vpop.eup %2724 }
 0x64d   : > { %v1198_v44 = vmul.f32 %v2725_v43, %v2721_v36  ;;  %v1349_v53 = vpop.permute.xlu1 %1348 }
 0x64f   : > { %v1200_v45 = vpack.c.bf16 %v1198_v44, %v1198_v44 }
 0x650   : > { %v2727_v46 = vpop.eup %2726 }
 0x651   : > { %v1199_v48 = vmul.f32 %v2727_v46, %v2723_v38  ;;  %2495 = vmatmul.mubr.msk.bf16.vlgmr.msra.gmra.mrb[12].mxu1 %vm861_vm3, %v1200_v45 }
 0x652   : > { %2505 = vmatpush3.bf16.xpose.msra.mxu1 %v1306_v47  ;;  %2506 = vmatprep.mubr.msk.bf16.mxu1 %vm2998_vm1, %v2997_v3 }
 0x653   : > { %v1201_v50 = vpack.c.bf16 %v1199_v48, %v1199_v48  ;;  %2516 = vmatprep.subr.bf16.mxu1 %v2997_v3 }
 0x655   : > { %2501 = vmatmul.mubr.msk.bf16.vlgmr.msra.gmra.mrb[16].mxu0 %vm861_vm3, %v1201_v50 }
 0x656   : > { %2511 = vmatpush3.bf16.xpose.msra.mxu0 %v1356_v51  ;;  %2512 = vmatprep.mubr.msk.bf16.mxu0 %vm2998_vm1, %v2997_v3 }
 0x657   : > { %2522 = vmatprep.subr.bf16.mxu0 %v2997_v3 }
 0x659   : > { %2507 = vmatmul.mubr.msk.bf16.vlgmr.msra.gmra.mrb[16].mxu1 %vm861_vm3, %v1299_v52 }
 0x65a   : > { %2518 = vmatprep.mubr.msk.bf16.mxu1 %vm2998_vm1, %v2997_v3 }
 0x65d   : > { %2513 = vmatmul.mubr.msk.bf16.vlgmr.msra.gmra.mrb[20].mxu0 %vm861_vm3, %v1349_v53 }
 0x65e   : > { %2524 = vmatprep.mubr.msk.bf16.mxu0 %vm2998_vm1, %v2997_v3 }
 0x724   : > { %v3493_v54 = vpop.f32.mrb[12].mxu1 }
 0x725   : > { %v2496_v55 = vpop.f32.mrb[13].mxu1 }
 0x726   : > { %v1247_v56 = vpop.f32.mrb[14].mxu1 }
 0x727   : > { %v2497_v57 = vpop.f32.mrb[15].mxu1 }
 0x728   : > { %v3495_v58 = vpop.f32.mrb[16].mxu0 }
 0x729   : > { %v2687_v59 = vpack.i.bf16 %v3495_v58, %v3493_v54  ;;  %v2502_v60 = vpop.f32.mrb[17].mxu0 }
 0x72a   : > { %v1295_v61 = vpop.f32.mrb[18].mxu0 }
 0x72b   : > { %v2503_v62 = vpop.f32.mrb[19].mxu0 }
 0x72c   : > { %v1342_v0 = vpop.f32.mrb[16].mxu1 }
 0x72d   : > { %v1343_v1 = vadd.f32 %v3418_v21, %v1342_v0  ;;  %v2508_v2 = vpop.f32.mrb[17].mxu1 }
 0x72e   : > { %v1345_v7 = vpop.f32.mrb[18].mxu1 }
 0x72f   : > { %v2509_v8 = vpop.f32.mrb[19].mxu1  ;;  %v1398_v9 = vsel %vm861_vm3, %v1343_v1, -inf }
 0x730   : > { %1399 = vmax.xlane.f32.xlu0 %v1398_v9  ;;  %v1392_v10 = vpop.f32.mrb[20].mxu0 }
 0x731   : > { %v1393_v11 = vadd.f32 %v3424_v26, %v1392_v10  ;;  %v2514_v12 = vpop.f32.mrb[21].mxu0 }
 0x732   : > { %v1395_v14 = vpop.f32.mrb[22].mxu0 }
 0x733   : > { %v2515_v15 = vpop.f32.mrb[23].mxu0  ;;  %v1401_v17 = vsel %vm861_vm3, %v1393_v11, -inf }
 0x734   : > { %1402 = vmax.xlane.f32.xlu1 %v1401_v17 }
 0x745   : > { %1422 = vrot.lane.b32.xlu1 %v3397_v13, %s3006_s17 }
 0x749   : > { %1520 = vrot.lane.b32.xlu1 %v3397_v13, %s3007_s0 }
 0x74d   : > { %1570 = vrot.lane.b32.xlu1 %v3400_v16, %s3007_s0 }
 0x751   : > { %1568 = vrot.lane.b32.xlu1 %v3400_v16, %s3008_s2 }
 0x7bd   : > { %v1400_v18 = vpop.xlane.xlu0 %1399 }
 0x7be   : > { %v1404_v19 = vsub.f32 %v1343_v1, %v1400_v18 }
 0x7c0   : > { %v1406_v20 = vmul.f32 1.442695, %v1404_v19 }
 0x7c1   : > { %v1403_v22 = vpop.xlane.xlu1 %1402 }
 0x7c2   : > { %2728 = vpow2.f32 %v1406_v20  ;;  %v1405_v23 = vsub.f32 %v1393_v11, %v1403_v22 }
 0x7c4   : > { %v1408_v24 = vmul.f32 1.442695, %v1405_v23 }
 0x7c5   : > { %v1423_v25 = vpop.permute.xlu1 %1422 }
 0x7c6   : > { %2730 = vpow2.f32 %v1408_v24  ;;  %v1428_v27 = vsel %vm986_vm4, %v1423_v25, 0 }
 0x7c7   : > { %2517 = vmatpush3.bf16.msra.mxu1 %v1428_v27 }
 0x7c8   : > { %2528 = vmatprep.subr.bf16.mxu1 %v2997_v3 }
 0x7c9   : > { %v1521_v37 = vpop.permute.xlu1 %1520 }
 0x7ca   : > { %v1526_v41 = vsel %vm861_vm3, %v1521_v37, 0 }
 0x7cc   : > { %v2729_v28 = vpop.eup %2728 }
 0x7cd   : > { %v1410_v29 = vsel %vm861_vm3, %v2729_v28, 0.0  ;;  %v1571_v43 = vpop.permute.xlu1 %1570 }
 0x7ce   : > { %1411 = vadd.xlane.f32.xlu0 %v1410_v29  ;;  %v1576_v45 = vsel %vm861_vm3, %v1571_v43, 0 }
 0x7d0   : > { %v2731_v30 = vpop.eup %2730 }
 0x7d1   : > { %v1413_v31 = vsel %vm861_vm3, %v2731_v30, 0.0  ;;  %v1569_v47 = vpop.permute.xlu1 %1568 }
 0x7d2   : > { %1414 = vadd.xlane.f32.xlu0 %v1413_v31 }
 0x7e8   : > { %1470 = vrot.lane.b32.xlu0 %v3400_v16, %s3006_s17 }
 0x7ec   : > { %1518 = vrot.lane.b32.xlu0 %v3397_v13, %s3008_s2 }
 0x85b   : > { %v1412_v32 = vpop.xlane.xlu0 %1411 }
 0x85c   : > { %2732 = vrcp.f32 %v1412_v32  ;;  %v2704_v32 = vld [vmem:[%s3348_s27] sm:$0xff]  }
 0x85f   : > { %v1415_v33 = vpop.xlane.xlu0 %1414 }
 0x860   : > { %2734 = vrcp.f32 %v1415_v33  ;;  %v2705_v33 = vld [vmem:[%s3348_s27 + $0x8] sm:$0xff]   ;;  %s3728_s27 = scalar_lea.vmem [#allocation6], %s3320_s11 }
 0x863   : > { %v1471_v34 = vpop.permute.xlu0 %1470 }
 0x864   : > { %v1476_v35 = vsel %vm986_vm4, %v1471_v34, 0 }
 0x865   : > { %2523 = vmatpush3.bf16.msra.mxu0 %v1476_v35 }
 0x866   : > { %v2733_v36 = vpop.eup %2732  ;;  %2534 = vmatprep.subr.bf16.mxu0 %v2997_v3 }
 0x867   : > { %v1418_v38 = vmul.f32 %v2733_v36, %v2729_v28  ;;  %v1519_v46 = vpop.permute.xlu0 %1518 }
 0x869   : > { %v1420_v39 = vpack.c.bf16 %v1418_v38, %v1418_v38 }
 0x86a   : > { %v2735_v40 = vpop.eup %2734 }
 0x86b   : > { %v1419_v42 = vmul.f32 %v2735_v40, %v2731_v30  ;;  %2519 = vmatmul.mubr.msk.bf16.vlgmr.msra.gmra.mrb[20].mxu1 %vm861_vm3, %v1420_v39 }
 0x86c   : > { %2529 = vmatpush3.bf16.xpose.msra.mxu1 %v1526_v41  ;;  %2530 = vmatprep.mubr.msk.bf16.mxu1 %vm2998_vm1, %v2997_v3 }
 0x86d   : > { %v1421_v44 = vpack.c.bf16 %v1419_v42, %v1419_v42  ;;  %2540 = vmatprep.subr.bf16.mxu1 %v2997_v3 }
 0x86f   : > { %2525 = vmatmul.mubr.msk.bf16.vlgmr.msra.gmra.mrb[24].mxu0 %vm861_vm3, %v1421_v44 }
 0x870   : > { %2535 = vmatpush3.bf16.xpose.msra.mxu0 %v1576_v45  ;;  %2536 = vmatprep.mubr.msk.bf16.mxu0 %vm2998_vm1, %v2997_v3 }
 0x871   : > { %2546 = vmatprep.subr.bf16.mxu0 %v2997_v3 }
 0x873   : > { %2531 = vmatmul.mubr.msk.bf16.vlgmr.msra.gmra.mrb[24].mxu1 %vm861_vm3, %v1519_v46 }
 0x874   : > { %2542 = vmatprep.mubr.msk.bf16.mxu1 %vm2998_vm1, %v2997_v3 }
 0x877   : > { %2537 = vmatmul.mubr.msk.bf16.vlgmr.msra.gmra.mrb[28].mxu0 %vm861_vm3, %v1569_v47 }
 0x878   : > { %2548 = vmatprep.mubr.msk.bf16.mxu0 %vm2998_vm1, %v2997_v3 }
 0x93e   : > { %v1464_v48 = vpop.f32.mrb[20].mxu1 }
 0x93f   : > { %v2520_v49 = vpop.f32.mrb[21].mxu1 }
 0x940   : > { %v1467_v50 = vpop.f32.mrb[22].mxu1 }
 0x941   : > { %v2521_v51 = vpop.f32.mrb[23].mxu1 }
 0x942   : > { %v1512_v52 = vpop.f32.mrb[24].mxu0 }
 0x943   : > { %v2692_v53 = vpack.i.bf16 %v1512_v52, %v1464_v48  ;;  %v2526_v55 = vpop.f32.mrb[25].mxu0 }
 0x944   : > { %v1515_v56 = vpop.f32.mrb[26].mxu0 }
 0x945   : > { %v2527_v57 = vpop.f32.mrb[27].mxu0 }
 0x946   : > { %v1562_v60 = vpop.f32.mrb[24].mxu1 }
 0x947   : > { %v1563_v61 = vadd.f32 %v3418_v21, %v1562_v60  ;;  %v2532_v62 = vpop.f32.mrb[25].mxu1 }
 0x948   : > { %v1565_v0 = vpop.f32.mrb[26].mxu1  ;;  %v2374_v62 = vld [vmem:[%s3728_s27] ss:$0 sm:$0xff] }
 0x949   : > { %v2533_v1 = vpop.f32.mrb[27].mxu1  ;;  %v1618_v2 = vsel %vm861_vm3, %v1563_v61, -inf }
 0x94a   : > { %1619 = vmax.xlane.f32.xlu0 %v1618_v2  ;;  %v1612_v7 = vpop.f32.mrb[28].mxu0 }
 0x94b   : > { %v1613_v8 = vadd.f32 %v3424_v26, %v1612_v7  ;;  %v2538_v9 = vpop.f32.mrb[29].mxu0 }
 0x94c   : > { %v1615_v10 = vpop.f32.mrb[30].mxu0 }
 0x94d   : > { %v2539_v11 = vpop.f32.mrb[31].mxu0  ;;  %v1621_v12 = vsel %vm861_vm3, %v1613_v8, -inf }
 0x94e   : > { %1622 = vmax.xlane.f32.xlu1 %v1621_v12 }
 0x95f   : > { %1642 = vrot.lane.b32.xlu1 %v3397_v13, %s3009_s4 }
 0x963   : > { %2688 = vrot.lane.b32.xlu1 %v2687_v59, %s3010_s8 }
 0x967   : > { %2693 = vrot.lane.b32.xlu1 %v2692_v53, %s3011_s1 }
 0x9d7   : > { %v1620_v21 = vpop.xlane.xlu0 %1619 }
 0x9d8   : > { %v1624_v14 = vsub.f32 %v1563_v61, %v1620_v21 }
 0x9da   : > { %v1626_v26 = vmul.f32 1.442695, %v1624_v14 }
 0x9db   : > { %v1623_v15 = vpop.xlane.xlu1 %1622 }
 0x9dc   : > { %2736 = vpow2.f32 %v1626_v26  ;;  %v1625_v17 = vsub.f32 %v1613_v8, %v1623_v15 }
 0x9de   : > { %v1628_v18 = vmul.f32 1.442695, %v1625_v17 }
 0x9df   : > { %v1643_v19 = vpop.permute.xlu1 %1642 }
 0x9e0   : > { %2738 = vpow2.f32 %v1628_v18  ;;  %v1648_v20 = vsel %vm986_vm4, %v1643_v19, 0 }
 0x9e1   : > { %2541 = vmatpush3.bf16.msra.mxu1 %v1648_v20  ;;  %v2706_v20 = vld [vmem:[%s3353_s29] sm:$0xff]  }
 0x9e2   : > { %2552 = vmatprep.subr.bf16.mxu1 %v2997_v3 }
 0x9e3   : > { %v2689_v43 = vpop.permute.xlu1 %2688 }
 0x9e4   : > { %v2691_v45 = vunpack.i.h.bf16 %v2689_v43  ;;  %v2690_v46 = vunpack.i.l.bf16 %v2689_v43 }
 0x9e6   : > { %v2737_v13 = vpop.eup %2736  ;;  %v1763_v50 = vsel %vm861_vm3, %v3459_v4, %v2691_v45  ;;  %v1762_v51 = vsel %vm861_vm3, %v3457_v63, %v2690_v46 }
 0x9e7   : > { %v1630_v54 = vsel %vm861_vm3, %v2737_v13, 0.0  ;;  %v2694_v44 = vpop.permute.xlu1 %2693 }
 0x9e8   : > { %1631 = vadd.xlane.f32.xlu0 %v1630_v54  ;;  %v2696_v47 = vunpack.i.h.bf16 %v2694_v44  ;;  %v2695_v48 = vunpack.i.l.bf16 %v2694_v44  ;;  %v2708_v54 = vld [vmem:[%s3359_s22] sm:$0xff]  }
 0x9ea   : > { %v2739_v58 = vpop.eup %2738  ;;  %v1765_v55 = vsel %vm1764_vm5, %v1762_v51, %v2695_v48  ;;  %v1766_v56 = vsel %vm1764_vm5, %v1763_v50, %v2696_v47 }
 0x9eb   : > { %v1633_v59 = vsel %vm861_vm3, %v2739_v58, 0.0 }
 0x9ec   : > { %1634 = vadd.xlane.f32.xlu0 %v1633_v59 }
 0xa02   : > { %1690 = vrot.lane.b32.xlu0 %v3400_v16, %s3009_s4 }
 0xa75   : > { %v1632_v22 = vpop.xlane.xlu0 %1631 }
 0xa76   : > { %2740 = vrcp.f32 %v1632_v22 }
 0xa79   : > { %v1635_v23 = vpop.xlane.xlu0 %1634 }
 0xa7a   : > { %2742 = vrcp.f32 %v1635_v23 }
 0xa7d   : > { %v1691_v24 = vpop.permute.xlu0 %1690 }
 0xa7e   : > { %v1696_v25 = vsel %vm986_vm4, %v1691_v24, 0 }
 0xa7f   : > { %2547 = vmatpush3.bf16.msra.mxu0 %v1696_v25 }
 0xa80   : > { %v2741_v27 = vpop.eup %2740  ;;  %2560 = vmatprep.subr.bf16.mxu0 %v2997_v3 }
 0xa81   : > { %v1638_v28 = vmul.f32 %v2741_v27, %v2737_v13  ;;  %v2707_v13 = vld [vmem:[%s3353_s29 + $0x8] sm:$0xff]   ;;  %s3729_s29 = scalar_lea.vmem [#allocation8], %s3320_s11 }
 0xa83   : > { %v1640_v29 = vpack.c.bf16 %v1638_v28, %v1638_v28 }
 0xa84   : > { %v2743_v30 = vpop.eup %2742 }
 0xa85   : > { %v1639_v31 = vmul.f32 %v2743_v30, %v2739_v58  ;;  %2543 = vmatmul.mubr.msk.bf16.vlgmr.msra.gmra.mrb[28].mxu1 %vm861_vm3, %v1640_v29  ;;  %v2709_v58 = vld [vmem:[%s3359_s22 + $0x8] sm:$0xff]   ;;  %v2378_v29 = vld [vmem:[%s3729_s29] ss:$0 sm:$0xff] }
 0xa86   : > { %2556 = vmatprep.mubr.msk.bf16.mxu1 %vm2998_vm1, %v2997_v3  ;;  %2553 = vmatpush3.bf16.msra.mxu1 %v2704_v32 }
 0xa87   : > { %v1641_v16 = vpack.c.bf16 %v1639_v31, %v1639_v31  ;;  %2554 = vmatprep.subr.bf16.mxu1 %v2997_v3 }
 0xa89   : > { %2549 = vmatmul.mubr.msk.bf16.vlgmr.msra.gmra.mrb[32].mxu0 %vm861_vm3, %v1641_v16 }
 0xa8a   : > { %2564 = vmatprep.mubr.msk.bf16.mxu0 %vm2998_vm1, %v2997_v3  ;;  %2555 = vmatpush3.bf16.msra.mxu1 %v2705_v33  ;;  %v2379_v33 = vld [vmem:[%s3730_s20] ss:$0 sm:$0xff] }
 0xa8b   : > { %2568 = vmatprep.subr.bf16.mxu1 %v2997_v3  ;;  %2561 = vmatpush3.bf16.msra.mxu0 %v2706_v20  ;;  %v2391_v20 = vld [vmem:[%s759_s23] ss:$0 sm:$0xff] }
 0xa8c   : > { %2562 = vmatprep.subr.bf16.mxu0 %v2997_v3 }
 0xa8f   : > { %2563 = vmatpush3.bf16.msra.mxu0 %v2707_v13 }
 0xb58   : > { %v1684_v34 = vpop.f32.mrb[28].mxu1 }
 0xb59   : > { %v2544_v35 = vpop.f32.mrb[29].mxu1 }
 0xb5a   : > { %v1687_v36 = vpop.f32.mrb[30].mxu1 }
 0xb5b   : > { %v2545_v37 = vpop.f32.mrb[31].mxu1 }
 0xb5c   : > { %v1732_v38 = vpop.f32.mrb[32].mxu0 }
 0xb5d   : > { %v2697_v39 = vpack.i.bf16 %v1732_v38, %v1684_v34  ;;  %v2550_v40 = vpop.f32.mrb[33].mxu0  ;;  %v2710_v38 = vld [vmem:[%s3359_s22 + $0x10] sm:$0xff]  }
 0xb5e   : > { %v1735_v41 = vpop.f32.mrb[34].mxu0  ;;  %v2380_v40 = vld [vmem:[%s635_s7] ss:$0 sm:$0xff] }
 0xb5f   : > { %2698 = vrot.lane.b32.xlu0 %v2697_v39, %s3012_s10  ;;  %v2551_v42 = vpop.f32.mrb[35].mxu0  ;;  %v2711_v39 = vld [vmem:[%s3359_s22 + $0x18] sm:$0xff]  }
 0xbd1   : > { %v2699_v49 = vpop.permute.xlu0 %2698 }
 0xbd2   : > { %v2701_v52 = vunpack.i.h.bf16 %v2699_v49  ;;  %v2700_v53 = vunpack.i.l.bf16 %v2699_v49 }
 0xbd4   : > { %v1769_v57 = vsel %vm1767_vm6, %v1766_v56, %v2701_v52  ;;  %v1768_v60 = vsel %vm1767_vm6, %v1765_v55, %v2700_v53 }
 0xbd5   : > { %v1770_v61 = vpack.c.bf16 %v1769_v57, %v1768_v60 }
 0xbd7   : > { %2557 = vmatmul.mubr.msk.bf16.vlgmr.msra.gmra.mrb[32].mxu1 %vm799_vm2, %v1770_v61 }
 0xbd8   : > { %2576 = vmatprep.mubr.msk.bf16.mxu1 %vm2998_vm1, %v2997_v3  ;;  %2569 = vmatpush3.bf16.msra.mxu1 %v2708_v54 }
 0xbd9   : > { %2570 = vmatprep.subr.bf16.mxu1 %v2997_v3 }
 0xbdc   : > { %2571 = vmatpush3.bf16.msra.mxu1 %v2709_v58 }
 0xbdd   : > { %2572 = vmatprep.subr.bf16.mxu1 %v2997_v3 }
 0xbe0   : > { %2573 = vmatpush3.bf16.msra.mxu1 %v2710_v38 }
 0xbe1   : > { %2574 = vmatprep.subr.bf16.mxu1 %v2997_v3  ;;  %v2384_v3 = vld [vmem:[%s753_s12] ss:$0 sm:$0xff] }
 0xbe4   : > { %2575 = vmatpush3.bf16.msra.mxu1 %v2711_v39 }
 0xcaa   : > { %v1831_v0 = vpop.f32.mrb[32].mxu1 }
 0xcab   : > { %v1832_v1 = vadd.f32 %v2374_v62, %v1831_v0  ;;  %v2558_v4 = vpop.f32.mrb[33].mxu1 }
 0xcac   : > { %v1834_v2 = vpop.f32.mrb[34].mxu1 }
 0xcad   : > { %v1835_v7 = vadd.f32 %v2374_v62, %v1834_v2  ;;  %v2559_v63 = vpop.f32.mrb[35].mxu1  ;;  %v1838_v8 = vadd.f32 %v1832_v1, %v3379_v5 }
 0xcaf   : > { %v1840_v9 = vsel %vm799_vm2, %v1838_v8, 0.0  ;;  %v1839_v10 = vadd.f32 %v1835_v7, %v3381_v6 }
 0xcb0   : > { %1841 = vadd.xlane.f32.xlu1 %v1840_v9 }
 0xcb1   : > { %v1843_v11 = vsel %vm799_vm2, %v1839_v10, 0.0 }
 0xcb2   : > { %1844 = vadd.xlane.f32.xlu0 %v1843_v11 }
 0xd3d   : > { %v1842_v12 = vpop.xlane.xlu1 %1841 }
 0xd3e   : > { %v1847_v21 = vmul.f32 0.03125, %v1842_v12 }
 0xd3f   : > { %v1845_v14 = vpop.xlane.xlu0 %1844 }
 0xd40   : > { %v1849_v26 = vsub.f32 %v1838_v8, %v1847_v21  ;;  %v1848_v15 = vmul.f32 0.03125, %v1845_v14 }
 0xd42   : > { %v1850_v17 = vsub.f32 %v1839_v10, %v1848_v15  ;;  %v1851_v18 = vmul.f32 %v1849_v26, %v1849_v26 }
 0xd44   : > { %v1853_v5 = vsel %vm799_vm2, %v1851_v18, 0.0  ;;  %v1852_v19 = vmul.f32 %v1850_v17, %v1850_v17 }
 0xd45   : > { %1854 = vadd.xlane.f32.xlu0 %v1853_v5  ;;  %v2390_v5 = vld [vmem:[%s756_s15] ss:$0 sm:$0xff] }
 0xd46   : > { %v1856_v6 = vsel %vm799_vm2, %v1852_v19, 0.0 }
 0xd47   : > { %1857 = vadd.xlane.f32.xlu1 %v1856_v6 }
 0xdd2   : > { %v1855_v59 = vpop.xlane.xlu0 %1854 }
 0xdd3   : > { %v1859_v22 = vmul.f32 0.03125, %v1855_v59 }
 0xdd4   : > { %v1858_v23 = vpop.xlane.xlu1 %1857 }
 0xdd5   : > { %v1861_v24 = vadd.f32 1e-05, %v1859_v22  ;;  %v1860_v25 = vmul.f32 0.03125, %v1858_v23 }
 0xdd7   : > { %2744 = vrsqrt.f32 %v1861_v24  ;;  %v1862_v27 = vadd.f32 1e-05, %v1860_v25 }
 0xdd9   : > { %2746 = vrsqrt.f32 %v1862_v27 }
 0xde1   : > { %v2745_v28 = vpop.eup %2744 }
 0xde2   : > { %v1865_v30 = vmul.f32 %v2745_v28, %v1849_v26 }
 0xde3   : > { %v2747_v31 = vpop.eup %2746 }
 0xde4   : > { %v1874_v16 = vmul.f32 %v2378_v29, %v1865_v30  ;;  %v1866_v32 = vmul.f32 %v2747_v31, %v1850_v17 }
 0xde6   : > { %v1875_v34 = vmul.f32 %v2378_v29, %v1866_v32  ;;  %v1883_v35 = vadd.f32 %v2379_v33, %v1874_v16 }
 0xde8   : > { %v1884_v36 = vadd.f32 %v2379_v33, %v1875_v34 }
 0xdea   : > { %v1885_v37 = vpack.c.bf16 %v1884_v36, %v1883_v35 }
 0xdec   : > { %2565 = vmatmul.mubr.msk.bf16.vlgmr.msra.gmra.mrb[36].mxu0 %vm799_vm2, %v1885_v37 }
 0xebf   : > { %v1946_v41 = vpop.f32.mrb[36].mxu0 }
 0xec0   : > { %v1947_v42 = vadd.f32 %v2380_v40, %v1946_v41  ;;  %v2566_v43 = vpop.f32.mrb[37].mxu0 }
 0xec1   : > { %v1949_v44 = vpop.f32.mrb[38].mxu0 }
 0xec2   : > { %v1950_v45 = vadd.f32 %v2380_v40, %v1949_v44  ;;  %v2567_v46 = vpop.f32.mrb[39].mxu0  ;;  %v1953_v47 = vmax.f32 %v1947_v42, 0.0 }
 0xec4   : > { %v1954_v48 = vmax.f32 %v1950_v45, 0.0 }
 0xec6   : > { %v1955_v49 = vpack.c.bf16 %v1954_v48, %v1953_v47 }
 0xec8   : > { %2577 = vmatmul.mubr.msk.bf16.vlgmr.msra.gmra.mrb[36].mxu1 %vm1995_vm7, %v1955_v49 }
 0xf9b   : > { %v2033_v50 = vpop.f32.mrb[36].mxu1 }
 0xf9c   : > { %v2034_v51 = vadd.f32 %v2384_v3, %v2033_v50  ;;  %v2578_v52 = vpop.f32.mrb[37].mxu1 }
 0xf9d   : > { %v2036_v53 = vpop.f32.mrb[38].mxu1 }
 0xf9e   : > { %v2037_v55 = vadd.f32 %v2384_v3, %v2036_v53  ;;  %v2579_v56 = vpop.f32.mrb[39].mxu1  ;;  %v2040_v57 = vadd.f32 %v2034_v51, %v1883_v35 }
 0xfa0   : > { %v2042_v60 = vsel %vm799_vm2, %v2040_v57, 0.0  ;;  %v2041_v61 = vadd.f32 %v2037_v55, %v1884_v36 }
 0xfa1   : > { %2043 = vadd.xlane.f32.xlu0 %v2042_v60 }
 0xfa2   : > { %v2045_v62 = vsel %vm799_vm2, %v2041_v61, 0.0 }
 0xfa3   : > { %2046 = vadd.xlane.f32.xlu1 %v2045_v62 }
0x102e   : > { %v2044_v0 = vpop.xlane.xlu0 %2043 }
0x102f   : > { %v2048_v1 = vmul.f32 0.03125, %v2044_v0 }
0x1030   : > { %v2047_v4 = vpop.xlane.xlu1 %2046 }
0x1031   : > { %v2050_v2 = vsub.f32 %v2040_v57, %v2048_v1  ;;  %v2049_v7 = vmul.f32 0.03125, %v2047_v4 }
0x1033   : > { %v2051_v63 = vsub.f32 %v2041_v61, %v2049_v7  ;;  %v2052_v8 = vmul.f32 %v2050_v2, %v2050_v2 }
0x1035   : > { %v2054_v9 = vsel %vm799_vm2, %v2052_v8, 0.0  ;;  %v2053_v10 = vmul.f32 %v2051_v63, %v2051_v63 }
0x1036   : > { %2055 = vadd.xlane.f32.xlu0 %v2054_v9 }
0x1037   : > { %v2057_v11 = vsel %vm799_vm2, %v2053_v10, 0.0 }
0x1038   : > { %2058 = vadd.xlane.f32.xlu1 %v2057_v11 }
0x10c3   : > { %v2056_v12 = vpop.xlane.xlu0 %2055 }
0x10c4   : > { %v2060_v21 = vmul.f32 0.03125, %v2056_v12 }
0x10c5   : > { %v2059_v14 = vpop.xlane.xlu1 %2058 }
0x10c6   : > { %v2062_v26 = vadd.f32 1e-05, %v2060_v21  ;;  %v2061_v15 = vmul.f32 0.03125, %v2059_v14 }
0x10c8   : > { %2748 = vrsqrt.f32 %v2062_v26  ;;  %v2063_v17 = vadd.f32 1e-05, %v2061_v15 }
0x10ca   : > { %2750 = vrsqrt.f32 %v2063_v17 }
0x10d2   : > { %v2749_v18 = vpop.eup %2748 }
0x10d3   : > { %v2066_v19 = vmul.f32 %v2749_v18, %v2050_v2  ;;  %2089 = sbr.rel (%p2392_p9) target bundleno = 4316 (0x10dc), region = 104 }
0x10d4   : > { %v2751_v6 = vpop.eup %2750 }
0x10d5   : > { %v2075_v13 = vmul.f32 %v2390_v5, %v2066_v19  ;;  %v2067_v54 = vmul.f32 %v2751_v6, %v2051_v63 }
0x10d7   : > { %v2084_v58 = vadd.f32 %v2391_v20, %v2075_v13  ;;  %v2076_v59 = vmul.f32 %v2390_v5, %v2067_v54 }
0x10d9   : > { %v2085_v22 = vadd.f32 %v2391_v20, %v2076_v59  ;;  %2090 = vst.msk [vmem:[#allocation2] sm:$0xff] (!%p2392_p9), %vm799_vm2, %v2084_v58 }
0x10db   : > { %2091 = vst.msk [vmem:[#allocation2 + $0x8] sm:$0xff] %vm799_vm2, %v2085_v22 }
0x10dc PF: > { %p2393_p12 = scmp.ne.s32.totalorder %s2980_s16, 1 }
0x10dd   : > { %2096 = vst.msk [vmem:[#allocation12] sm:$0xff] (!%p2393_p12), %vm799_vm2, %v2084_v58  ;;  %2097 = vst.msk [vmem:[#allocation12 + $0x8] sm:$0xff] (!%p2393_p12), %vm799_vm2, %v2085_v22 }
0x10de   : > { %2095 = sbr.rel (%p2393_p12) target bundleno = 4325 (0x10e5), region = 108 }
0x10e5 PF: > { %p2616_p13 = scmp.eq.s32.totalorder %s3215_s5, 1  ;;  %s3013_s18 = smov [#allocation12]  }
0x10e6   : > { %s2107_s15 = sshll.u32 %s3013_s18, 4  ;;  %s2108_s15 = int_to_ptr.vmem [resolvable:$true] %s2107_s15 }
0x10e7   : > { %s2900_s23 = scalar_lea.vmem %s2108_s15, 256  ;;  %p2907_p0 = scmp.lt.s32.totalorder %s2108_s15, %s2108_s15 }
0x10e8   : > { %p2901_p8 = scmp.ne.s32.totalorder %s2108_s15, %s2900_s23  ;;  %p2908_p1 = scmp.lt.s32.totalorder %s2900_s23, %s2900_s23 }
0x10ea   : > { %p2902_p2 = pnand %p2901_p8, %p2616_p13  ;;  %p2909_p7 = por %p2908_p1, %p2907_p0 }
0x10ec   : > { %p2903_p6 = pneg %p2902_p2 }
0x10ee   : > { %p2910_p10 = pnand %p2909_p7, %p2903_p6 }
0x10f0   : > { %2913 = shalt.err (!%p2910_p10)
}
0x10f1   : > { %s3734_s14 = sld [smem:[#allocation33_spill]] }
0x10f7   : > { %s2914_s17 = scalar_lea.hbm %s3734_s14, 256 }
0x10f8   : > { %p2915_p11 = scmp.ne.s32.totalorder %s3734_s14, %s2914_s17  ;;  %p2920_p4 = scmp.lt.u32.totalorder %s2914_s17, %s3734_s14 }
0x10fa   : > { %p2916_p5 = pnand %p2915_p11, %p2616_p13 }
0x10fc   : > { %p2917_p3 = pneg %p2916_p5 }
0x10fe   : > { %p2922_p9 = pnand %p2920_p4, %p2917_p3 }
0x1100   : > { %2925 = shalt.err (!%p2922_p9)
}
0x1101   : > { %s3014_s10 = smov 128  }
0x1102   : > { %2593 = dma.vmem_to_hbm [thread:$0]  (%p2616_p13), %s2108_s15, 256, %s3734_s14, [#allocation5], %s3014_s10, %s3014_s10, %s3010_s8  }
0x1103   : > { %2963 = dma.done.wait (%p2616_p13), [#allocation5], 256  }
0x1104   : > { %2965 = vsyncadd (%p2616_p13), [#allocation5], 4294967040 }
0x1105 PF: > { %s3735_s20 = sld [smem:[#allocation19_spill]]  ;;  %s3736_s24 = sld [smem:[#allocation17_spill]] }
0x1106   : > { %s3737_s15 = sld [smem:[#allocation21_spill]]  ;;  %s3738_s16 = sld [smem:[#allocation18_spill]] }
0x1107   : > { %s3739_s17 = sld [smem:[#allocation20_spill]]  ;;  %s3740_s29 = smov %s2972_s30 }
0x110b   : > { %s32_s18 = sadd.s32 1, %s3735_s20   ;;  %s3741_s30 = smov %s3736_s24 }
0x110c   : > { %p29_p12 = scmp.ge.s32.totalorder %s32_s18, 4  }
0x110e   :  { %31 = sbr.rel (!%p29_p12) target bundleno = 21 (0x15), region = 194 }
0x1115   :  { %2123 = vsyncpa [#allocation4], 1 }
0x1116   :  { %2125 = vsyncpa [#allocation4 + $0x1], 1 }
0x1117   :  { %2126 = vsyncpa [#allocation7], 1 }
0x1118   :  { %2128 = vsyncpa [#allocation7 + $0x1], 1 }
0x1119   :  { %2129 = vsyncpa [#allocation10], 1 }
0x111a   :  { %2131 = vsyncpa [#allocation10 + $0x1], 1 }
0x111b   :  { %2132 = vsyncpa [#allocation5], 1 }
0x111c   :  { %2134 = vsyncpa [#allocation5 + $0x1], 1 }

</bundles_post_ra>
